<compile_context>
chip_gen: v6e
topology: v6e:2x2x1
jax: 0.10.0
libtpu: 0.0.40
codegen_flags: <defaults>
</compile_context>

<pallas_src>
import jax
import jax.numpy as jnp
from jax import lax
from jax.experimental import pallas as pl
from jax.experimental.pallas import tpu as pltpu


def lstm_classifier_kernel(tmax_ref, len_ref, emb_ref, wih_ref, whh_ref,
                           b_ref, h0_ref, c0_ref, wout_ref, bout_ref,
                           out_ref, h_sc, c_sc, xw_sc):
    j = pl.program_id(1)                     # time-chunk index ("arbitrary")
    nt = pl.num_programs(1)
    Tc, B_blk, E = emb_ref.shape
    H = h0_ref.shape[1]
    t_max = tmax_ref[0]                      # longest real sequence (SMEM)
    base_t = j * Tc

    # ---- chunk 0: load initial hidden/cell state into persistent scratch ----
    @pl.when(j == 0)
    def _():
        h_sc[...] = h0_ref[...]
        c_sc[...] = c0_ref[...]

    # ---- skip chunks that are entirely padding ----
    @pl.when(base_t < t_max)
    def _():
        # Hoisted per-chunk input projection: one bf16 MXU matmul, bias fused.
        x2d = emb_ref[...].reshape(Tc * B_blk, E)              # bf16
        xw_sc[...] = (jnp.dot(x2d, wih_ref[...],
                              preferred_element_type=jnp.float32)
                      + b_ref[...])                            # (Tc*B, 4H) f32

        lengths_b = len_ref[...]     # (B_blk, H) int32, pre-broadcast (hoisted)

        def step(tt, carry):
            h = h_sc[...]                                      # (B_blk, H) f32
            c = c_sc[...]
            row0 = pl.multiple_of(tt * B_blk, B_blk)
            gates = (xw_sc[pl.ds(row0, B_blk), :]
                     + jnp.dot(h.astype(whh_ref.dtype), whh_ref[...],
                               preferred_element_type=jnp.float32))
            # PyTorch nn.LSTM gate order: i, f, g, o. H is a multiple of 128,
            # so each gate slice is a lane-aligned full vreg.
            i_g = jax.nn.sigmoid(gates[:, 0:H])
            f_g = jax.nn.sigmoid(gates[:, H:2 * H])
            g_g = jnp.tanh(gates[:, 2 * H:3 * H])
            o_g = jax.nn.sigmoid(gates[:, 3 * H:4 * H])
            c_new = f_g * c + i_g * g_g
            h_new = o_g * jnp.tanh(c_new)
            # pack_padded_sequence semantics: state frozen once t >= length.
            mask = (base_t + tt) < lengths_b
            h_sc[...] = jnp.where(mask, h_new, h)
            c_sc[...] = jnp.where(mask, c_new, c)
            return carry

        lax.fori_loop(0, Tc, step, 0, unroll=min(Tc, 8))

    # ---- last chunk: classifier head ----
    # TODO(synk): nn.Dropout(p=0.2) is identity in eval mode; not applied.
    @pl.when(j == nt - 1)
    def _():
        logits = (jnp.dot(h_sc[...].astype(wout_ref.dtype), wout_ref[...],
                          preferred_element_type=jnp.float32)
                  + bout_ref[...])                             # (B_blk, O_pad)
        # LogSoftmax over dim=1; padded lanes hold -1e30 so they never win the
        # max and contribute ~0 to the sum.
        m = jnp.max(logits, axis=1, keepdims=True)
        shifted = logits - m
        out_ref[...] = shifted - jnp.log(
            jnp.sum(jnp.exp(shifted), axis=1, keepdims=True))


def _round_up(x, m):
    return (x + m - 1) // m * m


def _nbytes(shape, dtype):
    n = 1
    for s in shape:
        n *= int(s)
    return n * jnp.dtype(dtype).itemsize


def lstm_classifier_forward(tokens, lengths, params, *, t_chunk=16,
                            b_block=None):
    """tokens: (T, B) int32 time-major; lengths: (B,) descending (packed)."""
    emb = params["embedding"]
    T, B = tokens.shape
    E = emb.shape[1]
    H = params["w_hh_t"].shape[0]
    O = params["w_out_t"].shape[1]

    # TPU-friendly padding: lane dims to 128, batch (sublanes) to 8.
    B_pad = _round_up(B, 8)
    E_pad = _round_up(E, 128)
    H_pad = _round_up(H, 128)
    O_pad = _round_up(O, 128)
    G_pad = 4 * H_pad
    Tc = max(1, min(t_chunk, T))
    T_pad = _round_up(T, Tc)
    nt = T_pad // Tc

    if b_block is None:
        b_block = B_pad              # set to B_pad // 2 on v7x to use both TCs
    assert b_block % 8 == 0 and B_pad % b_block == 0
    nb = B_pad // b_block

    # Embedding lookup (row gather) kept in XLA glue for now (see TODO above).
    embeds = jnp.take(emb, tokens, axis=0)                         # (T, B, E)
    embeds = jnp.pad(embeds, ((0, T_pad - T), (0, B_pad - B), (0, E_pad - E)))
    embeds = embeds.astype(jnp.bfloat16)

    def pad_gate_cols(w, rows_pad):
        # (rows, 4H) -> (rows_pad, 4*H_pad) keeping each i/f/g/o gate block
        # lane-aligned at multiples of H_pad. Zero padding keeps real lanes
        # numerically identical (padded h/c lanes stay exactly 0).
        rows = w.shape[0]
        w4 = w.reshape(rows, 4, H)
        w4 = jnp.pad(w4, ((0, rows_pad - rows), (0, 0), (0, H_pad - H)))
        return w4.reshape(rows_pad, 4 * H_pad)

    w_ih_p = pad_gate_cols(params["w_ih_t"], E_pad).astype(jnp.bfloat16)
    w_hh_p = pad_gate_cols(params["w_hh_t"], H_pad).astype(jnp.bfloat16)
    b_p = pad_gate_cols(params["b_ih"] + params["b_hh"], 1)       # (1,4H) f32
    h0_p = jnp.pad(params["h0"], ((0, B_pad - B), (0, H_pad - H)))
    c0_p = jnp.pad(params["c0"], ((0, B_pad - B), (0, H_pad - H)))
    w_out_p = jnp.pad(params["w_out_t"],
                      ((0, H_pad - H), (0, O_pad - O))).astype(jnp.bfloat16)
    b_out_p = jnp.pad(params["b_out"], ((0, 0), (0, O_pad - O)),
                      constant_values=-1e30)                      # (1, O_pad)

    lengths32 = lengths.astype(jnp.int32)
    lengths_p = jnp.pad(lengths32, (0, B_pad - B))
    # Hoisted broadcast (JAX does not CSE broadcast_in_dim inside loops).
    lengths_bcast = jnp.broadcast_to(lengths_p[:, None], (B_pad, H_pad))
    t_max = jnp.max(lengths32).reshape(1)                         # (1,) int32

    # Explicit VMEM budget from actual buffer sizes (double-buffered inputs +
    # persistent scratch); capped at 48 MiB so it also fits v7x's 64 MiB VMEM.
    dbuf = 2 * (_nbytes((b_block, H_pad), jnp.int32)
                + _nbytes((Tc, b_block, E_pad), jnp.bfloat16)
                + _nbytes((E_pad, G_pad), jnp.bfloat16)
                + _nbytes((H_pad, G_pad), jnp.bfloat16)
                + _nbytes((1, G_pad), jnp.float32)
                + 2 * _nbytes((b_block, H_pad), jnp.float32)
                + _nbytes((H_pad, O_pad), jnp.bfloat16)
                + _nbytes((1, O_pad), jnp.float32)
                + _nbytes((b_block, O_pad), jnp.float32))
    scratch = (2 * _nbytes((b_block, H_pad), jnp.float32)
               + _nbytes((Tc * b_block, G_pad), jnp.float32))
    vmem_limit = int(min(max(dbuf + scratch + (4 << 20), 16 << 20), 48 << 20))

    grid_spec = pltpu.PrefetchScalarGridSpec(
        num_scalar_prefetch=1,                                   # t_max -> SMEM
        grid=(nb, nt),
        in_specs=[
            pl.BlockSpec((b_block, H_pad), lambda b, j, tm: (b, 0)),  # lengths
            pl.BlockSpec((Tc, b_block, E_pad), lambda b, j, tm: (j, b, 0)),
            pl.BlockSpec((E_pad, G_pad), lambda b, j, tm: (0, 0)),    # W_ih
            pl.BlockSpec((H_pad, G_pad), lambda b, j, tm: (0, 0)),    # W_hh
            pl.BlockSpec((1, G_pad), lambda b, j, tm: (0, 0)),        # bias
            pl.BlockSpec((b_block, H_pad), lambda b, j, tm: (b, 0)),  # h0
            pl.BlockSpec((b_block, H_pad), lambda b, j, tm: (b, 0)),  # c0
            pl.BlockSpec((H_pad, O_pad), lambda b, j, tm: (0, 0)),    # W_out
            pl.BlockSpec((1, O_pad), lambda b, j, tm: (0, 0)),        # b_out
        ],
        out_specs=pl.BlockSpec((b_block, O_pad), lambda b, j, tm: (b, 0)),
        scratch_shapes=[
            pltpu.VMEM((b_block, H_pad), jnp.float32),          # h state
            pltpu.VMEM((b_block, H_pad), jnp.float32),          # c state
            pltpu.VMEM((Tc * b_block, G_pad), jnp.float32),     # x @ W_ih + b
        ],
    )

    out = pl.pallas_call(
        lstm_classifier_kernel,
        out_shape=jax.ShapeDtypeStruct((B_pad, O_pad), jnp.float32),
        grid_spec=grid_spec,
        compiler_params=pltpu.CompilerParams(
            dimension_semantics=("parallel", "arbitrary"),
            vmem_limit_bytes=vmem_limit),
    )(t_max, lengths_bcast, embeds, w_ih_p, w_hh_p, b_p, h0_p, c0_p,
      w_out_p, b_out_p)
    return out[:B, :O]


def init_params(key, vocab_size, embedding_dim, hidden_dim, output_size,
                batch_size):
    ks = jax.random.split(key, 9)
    s = 1.0 / jnp.sqrt(jnp.float32(hidden_dim))
    # Weights stored pre-transposed so the kernel does x @ W without .T
    return {
        "embedding": jax.random.normal(
            ks[0], (vocab_size, embedding_dim), jnp.float32),
        "w_ih_t": jax.random.uniform(
            ks[1], (embedding_dim, 4 * hidden_dim), jnp.float32, -s, s),
        "w_hh_t": jax.random.uniform(
            ks[2], (hidden_dim, 4 * hidden_dim), jnp.float32, -s, s),
        "b_ih": jax.random.uniform(
            ks[3], (1, 4 * hidden_dim), jnp.float32, -s, s),
        "b_hh": jax.random.uniform(
            ks[4], (1, 4 * hidden_dim), jnp.float32, -s, s),
        "w_out_t": jax.random.uniform(
            ks[5], (hidden_dim, output_size), jnp.float32, -s, s),
        "b_out": jax.random.uniform(
            ks[6], (1, output_size), jnp.float32, -s, s),
        # TODO(synk): PyTorch init_hidden draws randn per forward call; here a
        # fixed deterministic draw is injected instead.
        "h0": jax.random.normal(ks[7], (batch_size, hidden_dim), jnp.float32),
        "c0": jax.random.normal(ks[8], (batch_size, hidden_dim), jnp.float32),
    }


if __name__ == "__main__":
    vocab_size, embedding_dim, hidden_dim, output_size = 50, 16, 32, 5
    T, B = 8, 2

    key = jax.random.PRNGKey(0)
    k_tok, k_par = jax.random.split(key)

    tokens = jax.random.randint(k_tok, (T, B), 0, vocab_size, dtype=jnp.int32)
    # pack_padded_sequence expects descending lengths
    lengths = jnp.array([8, 5], dtype=jnp.int32)

    params = init_params(k_par, vocab_size, embedding_dim, hidden_dim,
                         output_size, B)

    out = lstm_classifier_forward(tokens, lengths, params)
    out = jax.block_until_ready(out)
    assert out.shape == (B, output_size)
    # log-softmax sanity: each row's probabilities sum to 1
    assert bool(jnp.allclose(jnp.sum(jnp.exp(out), axis=1), 1.0, atol=1e-3))
    print("KERNEL_OK")
</pallas_src>

<mosaic_0001>
module attributes {stable_mosaic.version = 11 : i64} {
  func.func @lstm_classifier_kernel(%arg0: i32, %arg1: i32, %arg2: memref<1xi32, #tpu.memory_space<smem>>, %arg3: memref<8x128xi32, #tpu.memory_space<vmem>>, %arg4: memref<8x8x128xbf16, #tpu.memory_space<vmem>>, %arg5: memref<128x512xbf16, #tpu.memory_space<vmem>>, %arg6: memref<128x512xbf16, #tpu.memory_space<vmem>>, %arg7: memref<1x512xf32, #tpu.memory_space<vmem>>, %arg8: memref<8x128xf32, #tpu.memory_space<vmem>>, %arg9: memref<8x128xf32, #tpu.memory_space<vmem>>, %arg10: memref<128x128xbf16, #tpu.memory_space<vmem>>, %arg11: memref<1x128xf32, #tpu.memory_space<vmem>>, %arg12: memref<8x128xf32, #tpu.memory_space<vmem>>, %arg13: memref<8x128xf32, #tpu.memory_space<vmem>>, %arg14: memref<8x128xf32, #tpu.memory_space<vmem>>, %arg15: memref<64x512xf32, #tpu.memory_space<vmem>>) attributes {dimension_semantics = [#tpu.dimension_semantics<parallel>, #tpu.dimension_semantics<arbitrary>], iteration_bounds = array<i64: 1, 1>, scalar_prefetch = 1 : i64, scratch_operands = 3 : i64, tpu.core_type = #tpu.core_type<tc>, window_params = [{transform_indices = @transform_0, window_bounds = array<i64: 8, 128>}, {transform_indices = @transform_1, window_bounds = array<i64: 8, 8, 128>}, {pipeline_mode = #tpu.pipeline_mode<synchronous>, transform_indices = @transform_2, window_bounds = array<i64: 128, 512>}, {pipeline_mode = #tpu.pipeline_mode<synchronous>, transform_indices = @transform_3, window_bounds = array<i64: 128, 512>}, {pipeline_mode = #tpu.pipeline_mode<synchronous>, transform_indices = @transform_4, window_bounds = array<i64: 1, 512>}, {transform_indices = @transform_5, window_bounds = array<i64: 8, 128>}, {transform_indices = @transform_6, window_bounds = array<i64: 8, 128>}, {pipeline_mode = #tpu.pipeline_mode<synchronous>, transform_indices = @transform_7, window_bounds = array<i64: 128, 128>}, {pipeline_mode = #tpu.pipeline_mode<synchronous>, transform_indices = @transform_8, window_bounds = array<i64: 1, 128>}, {transform_indices = @transform_9, window_bounds = array<i64: 8, 128>}]} {
    %c0 = arith.constant 0 : index
    %0 = memref.load %arg2[%c0] : memref<1xi32, #tpu.memory_space<smem>>
    %c8_i32 = arith.constant 8 : i32
    %1 = arith.muli %arg1, %c8_i32 : i32
    %c0_i32 = arith.constant 0 : i32
    %2 = arith.cmpi eq, %arg1, %c0_i32 : i32
    %3 = arith.extui %2 : i1 to i32
    %c0_i32_0 = arith.constant 0 : i32
    %4 = arith.cmpi ne, %3, %c0_i32_0 : i32
    scf.if %4 {
      %c0_4 = arith.constant 0 : index
      %c0_5 = arith.constant 0 : index
      %11 = vector.load %arg8[%c0_4, %c0_5] : memref<8x128xf32, #tpu.memory_space<vmem>>, vector<8x128xf32>
      %c0_6 = arith.constant 0 : index
      %c0_7 = arith.constant 0 : index
      %12 = vector.load %arg13[%c0_6, %c0_7] : memref<8x128xf32, #tpu.memory_space<vmem>>, vector<8x128xf32>
      tpu.vector_store %arg13[%c0_6, %c0_7], %11 {strides = array<i32>} : memref<8x128xf32, #tpu.memory_space<vmem>>, vector<8x128xf32>,
      %c0_8 = arith.constant 0 : index
      %c0_9 = arith.constant 0 : index
      %13 = vector.load %arg9[%c0_8, %c0_9] : memref<8x128xf32, #tpu.memory_space<vmem>>, vector<8x128xf32>
      %c0_10 = arith.constant 0 : index
      %c0_11 = arith.constant 0 : index
      %14 = vector.load %arg14[%c0_10, %c0_11] : memref<8x128xf32, #tpu.memory_space<vmem>>, vector<8x128xf32>
      tpu.vector_store %arg14[%c0_10, %c0_11], %13 {strides = array<i32>} : memref<8x128xf32, #tpu.memory_space<vmem>>, vector<8x128xf32>,
    } else {
    }
    %5 = arith.cmpi slt, %1, %0 : i32
    %6 = arith.extui %5 : i1 to i32
    %c0_i32_1 = arith.constant 0 : i32
    %7 = arith.cmpi ne, %6, %c0_i32_1 : i32
    scf.if %7 {
      %c0_4 = arith.constant 0 : index
      %c0_5 = arith.constant 0 : index
      %c0_6 = arith.constant 0 : index
      %11 = vector.load %arg4[%c0_4, %c0_5, %c0_6] : memref<8x8x128xbf16, #tpu.memory_space<vmem>>, vector<8x8x128xbf16>
      %12 = vector.shape_cast %11 : vector<8x8x128xbf16> to vector<64x128xbf16>
      %c0_7 = arith.constant 0 : index
      %c0_8 = arith.constant 0 : index
      %13 = vector.load %arg5[%c0_7, %c0_8] : memref<128x512xbf16, #tpu.memory_space<vmem>>, vector<128x512xbf16>
      %cst = arith.constant dense<0.000000e+00> : vector<64x512xf32>
      %14 = tpu.matmul %12, %13, %cst {dimension_numbers = #tpu.dot_dimension_numbers<[1], [0], [0], [1], [0, 0, 1, 1], [], []>} : vector<64x128xbf16>, vector<128x512xbf16>, vector<64x512xf32> -> vector<64x512xf32>
      %c0_9 = arith.constant 0 : index
      %c0_10 = arith.constant 0 : index
      %15 = vector.load %arg7[%c0_9, %c0_10] : memref<1x512xf32, #tpu.memory_space<vmem>>, vector<1x512xf32>
      %16 = vector.broadcast %15 : vector<1x512xf32> to vector<64x512xf32>
      %17 = arith.addf %14, %16 : vector<64x512xf32>
      %c0_11 = arith.constant 0 : index
      %c0_12 = arith.constant 0 : index
      %18 = vector.load %arg15[%c0_11, %c0_12] : memref<64x512xf32, #tpu.memory_space<vmem>>, vector<64x512xf32>
      tpu.vector_store %arg15[%c0_11, %c0_12], %17 {strides = array<i32>} : memref<64x512xf32, #tpu.memory_space<vmem>>, vector<64x512xf32>,
      %c0_13 = arith.constant 0 : index
      %c0_14 = arith.constant 0 : index
      %19 = vector.load %arg3[%c0_13, %c0_14] : memref<8x128xi32, #tpu.memory_space<vmem>>, vector<8x128xi32>
      %c0_i32_15 = arith.constant 0 : i32
      %c0_16 = arith.constant 0 : index
      %c0_17 = arith.constant 0 : index
      %20 = vector.load %arg13[%c0_16, %c0_17] : memref<8x128xf32, #tpu.memory_space<vmem>>, vector<8x128xf32>
      %c0_18 = arith.constant 0 : index
      %c0_19 = arith.constant 0 : index
      %21 = vector.load %arg14[%c0_18, %c0_19] : memref<8x128xf32, #tpu.memory_space<vmem>>, vector<8x128xf32>
      %c8_i32_20 = arith.constant 8 : i32
      %22 = arith.muli %c0_i32_15, %c8_i32_20 : i32
      %23 = tpu.assume_multiple %22, 8 : i32
      %24 = arith.index_cast %23 : i32 to index
      %c0_21 = arith.constant 0 : index
      %25 = vector.load %arg15[%24, %c0_21] : memref<64x512xf32, #tpu.memory_space<vmem>>, vector<8x512xf32>
      %26 = arith.truncf %20 : vector<8x128xf32> to vector<8x128xbf16>
      %c0_22 = arith.constant 0 : index
      %c0_23 = arith.constant 0 : index
      %27 = vector.load %arg6[%c0_22, %c0_23] : memref<128x512xbf16, #tpu.memory_space<vmem>>, vector<128x512xbf16>
      %cst_24 = arith.constant dense<0.000000e+00> : vector<8x512xf32>
      %28 = tpu.matmul %26, %27, %cst_24 {dimension_numbers = #tpu.dot_dimension_numbers<[1], [0], [0], [1], [0, 0, 1, 1], [], []>} : vector<8x128xbf16>, vector<128x512xbf16>, vector<8x512xf32> -> vector<8x512xf32>
      %29 = arith.addf %25, %28 : vector<8x512xf32>
      %30 = vector.extract_strided_slice %29 {offsets = [0, 0], sizes = [8, 128], strides = [1, 1]} : vector<8x512xf32> to vector<8x128xf32>
      %31 = arith.negf %30 : vector<8x128xf32>
      %32 = math.exp %31 : vector<8x128xf32>
      %cst_25 = arith.constant 1.000000e+00 : f32
      %33 = vector.broadcast %cst_25 : f32 to vector<8x128xf32>
      %34 = arith.addf %33, %32 : vector<8x128xf32>
      %35 = arith.divf %33, %34 : vector<8x128xf32>
      %36 = vector.extract_strided_slice %29 {offsets = [0, 128], sizes = [8, 128], strides = [1, 1]} : vector<8x512xf32> to vector<8x128xf32>
      %37 = arith.negf %36 : vector<8x128xf32>
      %38 = math.exp %37 : vector<8x128xf32>
      %cst_26 = arith.constant 1.000000e+00 : f32
      %39 = vector.broadcast %cst_26 : f32 to vector<8x128xf32>
      %40 = arith.addf %39, %38 : vector<8x128xf32>
      %41 = arith.divf %39, %40 : vector<8x128xf32>
      %42 = vector.extract_strided_slice %29 {offsets = [0, 256], sizes = [8, 128], strides = [1, 1]} : vector<8x512xf32> to vector<8x128xf32>
      %43 = math.tanh %42 : vector<8x128xf32>
      %44 = vector.extract_strided_slice %29 {offsets = [0, 384], sizes = [8, 128], strides = [1, 1]} : vector<8x512xf32> to vector<8x128xf32>
      %45 = arith.negf %44 : vector<8x128xf32>
      %46 = math.exp %45 : vector<8x128xf32>
      %cst_27 = arith.constant 1.000000e+00 : f32
      %47 = vector.broadcast %cst_27 : f32 to vector<8x128xf32>
      %48 = arith.addf %47, %46 : vector<8x128xf32>
      %49 = arith.divf %47, %48 : vector<8x128xf32>
      %50 = arith.mulf %41, %21 : vector<8x128xf32>
      %51 = arith.mulf %35, %43 : vector<8x128xf32>
      %52 = arith.addf %50, %51 : vector<8x128xf32>
      %53 = math.tanh %52 : vector<8x128xf32>
      %54 = arith.mulf %49, %53 : vector<8x128xf32>
      %55 = arith.addi %1, %c0_i32_15 : i32
      %56 = vector.broadcast %55 : i32 to vector<8x128xi32>
      %57 = arith.cmpi slt, %56, %19 : vector<8x128xi32>
      %58 = arith.select %57, %54, %20 : vector<8x128xi1>, vector<8x128xf32>
      %c0_28 = arith.constant 0 : index
      %c0_29 = arith.constant 0 : index
      %59 = vector.load %arg13[%c0_28, %c0_29] : memref<8x128xf32, #tpu.memory_space<vmem>>, vector<8x128xf32>
      tpu.vector_store %arg13[%c0_28, %c0_29], %58 {strides = array<i32>} : memref<8x128xf32, #tpu.memory_space<vmem>>, vector<8x128xf32>,
      %60 = arith.select %57, %52, %21 : vector<8x128xi1>, vector<8x128xf32>
      %c0_30 = arith.constant 0 : index
      %c0_31 = arith.constant 0 : index
      %61 = vector.load %arg14[%c0_30, %c0_31] : memref<8x128xf32, #tpu.memory_space<vmem>>, vector<8x128xf32>
      tpu.vector_store %arg14[%c0_30, %c0_31], %60 {strides = array<i32>} : memref<8x128xf32, #tpu.memory_space<vmem>>, vector<8x128xf32>,
      %c1_i32 = arith.constant 1 : i32
      %c0_32 = arith.constant 0 : index
      %c0_33 = arith.constant 0 : index
      %62 = vector.load %arg13[%c0_32, %c0_33] : memref<8x128xf32, #tpu.memory_space<vmem>>, vector<8x128xf32>
      %c0_34 = arith.constant 0 : index
      %c0_35 = arith.constant 0 : index
      %63 = vector.load %arg14[%c0_34, %c0_35] : memref<8x128xf32, #tpu.memory_space<vmem>>, vector<8x128xf32>
      %c8_i32_36 = arith.constant 8 : i32
      %64 = arith.muli %c1_i32, %c8_i32_36 : i32
      %65 = tpu.assume_multiple %64, 8 : i32
      %66 = arith.index_cast %65 : i32 to index
      %c0_37 = arith.constant 0 : index
      %67 = vector.load %arg15[%66, %c0_37] : memref<64x512xf32, #tpu.memory_space<vmem>>, vector<8x512xf32>
      %68 = arith.truncf %62 : vector<8x128xf32> to vector<8x128xbf16>
      %c0_38 = arith.constant 0 : index
      %c0_39 = arith.constant 0 : index
      %69 = vector.load %arg6[%c0_38, %c0_39] : memref<128x512xbf16, #tpu.memory_space<vmem>>, vector<128x512xbf16>
      %cst_40 = arith.constant dense<0.000000e+00> : vector<8x512xf32>
      %70 = tpu.matmul %68, %69, %cst_40 {dimension_numbers = #tpu.dot_dimension_numbers<[1], [0], [0], [1], [0, 0, 1, 1], [], []>} : vector<8x128xbf16>, vector<128x512xbf16>, vector<8x512xf32> -> vector<8x512xf32>
      %71 = arith.addf %67, %70 : vector<8x512xf32>
      %72 = vector.extract_strided_slice %71 {offsets = [0, 0], sizes = [8, 128], strides = [1, 1]} : vector<8x512xf32> to vector<8x128xf32>
      %73 = arith.negf %72 : vector<8x128xf32>
      %74 = math.exp %73 : vector<8x128xf32>
      %cst_41 = arith.constant 1.000000e+00 : f32
      %75 = vector.broadcast %cst_41 : f32 to vector<8x128xf32>
      %76 = arith.addf %75, %74 : vector<8x128xf32>
      %77 = arith.divf %75, %76 : vector<8x128xf32>
      %78 = vector.extract_strided_slice %71 {offsets = [0, 128], sizes = [8, 128], strides = [1, 1]} : vector<8x512xf32> to vector<8x128xf32>
      %79 = arith.negf %78 : vector<8x128xf32>
      %80 = math.exp %79 : vector<8x128xf32>
      %cst_42 = arith.constant 1.000000e+00 : f32
      %81 = vector.broadcast %cst_42 : f32 to vector<8x128xf32>
      %82 = arith.addf %81, %80 : vector<8x128xf32>
      %83 = arith.divf %81, %82 : vector<8x128xf32>
      %84 = vector.extract_strided_slice %71 {offsets = [0, 256], sizes = [8, 128], strides = [1, 1]} : vector<8x512xf32> to vector<8x128xf32>
      %85 = math.tanh %84 : vector<8x128xf32>
      %86 = vector.extract_strided_slice %71 {offsets = [0, 384], sizes = [8, 128], strides = [1, 1]} : vector<8x512xf32> to vector<8x128xf32>
      %87 = arith.negf %86 : vector<8x128xf32>
      %88 = math.exp %87 : vector<8x128xf32>
      %cst_43 = arith.constant 1.000000e+00 : f32
      %89 = vector.broadcast %cst_43 : f32 to vector<8x128xf32>
      %90 = arith.addf %89, %88 : vector<8x128xf32>
      %91 = arith.divf %89, %90 : vector<8x128xf32>
      %92 = arith.mulf %83, %63 : vector<8x128xf32>
      %93 = arith.mulf %77, %85 : vector<8x128xf32>
      %94 = arith.addf %92, %93 : vector<8x128xf32>
      %95 = math.tanh %94 : vector<8x128xf32>
      %96 = arith.mulf %91, %95 : vector<8x128xf32>
      %97 = arith.addi %1, %c1_i32 : i32
      %98 = vector.broadcast %97 : i32 to vector<8x128xi32>
      %99 = arith.cmpi slt, %98, %19 : vector<8x128xi32>
      %100 = arith.select %99, %96, %62 : vector<8x128xi1>, vector<8x128xf32>
      %c0_44 = arith.constant 0 : index
      %c0_45 = arith.constant 0 : index
      %101 = vector.load %arg13[%c0_44, %c0_45] : memref<8x128xf32, #tpu.memory_space<vmem>>, vector<8x128xf32>
      tpu.vector_store %arg13[%c0_44, %c0_45], %100 {strides = array<i32>} : memref<8x128xf32, #tpu.memory_space<vmem>>, vector<8x128xf32>,
      %102 = arith.select %99, %94, %63 : vector<8x128xi1>, vector<8x128xf32>
      %c0_46 = arith.constant 0 : index
      %c0_47 = arith.constant 0 : index
      %103 = vector.load %arg14[%c0_46, %c0_47] : memref<8x128xf32, #tpu.memory_space<vmem>>, vector<8x128xf32>
      tpu.vector_store %arg14[%c0_46, %c0_47], %102 {strides = array<i32>} : memref<8x128xf32, #tpu.memory_space<vmem>>, vector<8x128xf32>,
      %c2_i32 = arith.constant 2 : i32
      %c0_48 = arith.constant 0 : index
      %c0_49 = arith.constant 0 : index
      %104 = vector.load %arg13[%c0_48, %c0_49] : memref<8x128xf32, #tpu.memory_space<vmem>>, vector<8x128xf32>
      %c0_50 = arith.constant 0 : index
      %c0_51 = arith.constant 0 : index
      %105 = vector.load %arg14[%c0_50, %c0_51] : memref<8x128xf32, #tpu.memory_space<vmem>>, vector<8x128xf32>
      %c8_i32_52 = arith.constant 8 : i32
      %106 = arith.muli %c2_i32, %c8_i32_52 : i32
      %107 = tpu.assume_multiple %106, 8 : i32
      %108 = arith.index_cast %107 : i32 to index
      %c0_53 = arith.constant 0 : index
      %109 = vector.load %arg15[%108, %c0_53] : memref<64x512xf32, #tpu.memory_space<vmem>>, vector<8x512xf32>
      %110 = arith.truncf %104 : vector<8x128xf32> to vector<8x128xbf16>
      %c0_54 = arith.constant 0 : index
      %c0_55 = arith.constant 0 : index
      %111 = vector.load %arg6[%c0_54, %c0_55] : memref<128x512xbf16, #tpu.memory_space<vmem>>, vector<128x512xbf16>
      %cst_56 = arith.constant dense<0.000000e+00> : vector<8x512xf32>
      %112 = tpu.matmul %110, %111, %cst_56 {dimension_numbers = #tpu.dot_dimension_numbers<[1], [0], [0], [1], [0, 0, 1, 1], [], []>} : vector<8x128xbf16>, vector<128x512xbf16>, vector<8x512xf32> -> vector<8x512xf32>
      %113 = arith.addf %109, %112 : vector<8x512xf32>
      %114 = vector.extract_strided_slice %113 {offsets = [0, 0], sizes = [8, 128], strides = [1, 1]} : vector<8x512xf32> to vector<8x128xf32>
      %115 = arith.negf %114 : vector<8x128xf32>
      %116 = math.exp %115 : vector<8x128xf32>
      %cst_57 = arith.constant 1.000000e+00 : f32
      %117 = vector.broadcast %cst_57 : f32 to vector<8x128xf32>
      %118 = arith.addf %117, %116 : vector<8x128xf32>
      %119 = arith.divf %117, %118 : vector<8x128xf32>
      %120 = vector.extract_strided_slice %113 {offsets = [0, 128], sizes = [8, 128], strides = [1, 1]} : vector<8x512xf32> to vector<8x128xf32>
      %121 = arith.negf %120 : vector<8x128xf32>
      %122 = math.exp %121 : vector<8x128xf32>
      %cst_58 = arith.constant 1.000000e+00 : f32
      %123 = vector.broadcast %cst_58 : f32 to vector<8x128xf32>
      %124 = arith.addf %123, %122 : vector<8x128xf32>
      %125 = arith.divf %123, %124 : vector<8x128xf32>
      %126 = vector.extract_strided_slice %113 {offsets = [0, 256], sizes = [8, 128], strides = [1, 1]} : vector<8x512xf32> to vector<8x128xf32>
      %127 = math.tanh %126 : vector<8x128xf32>
      %128 = vector.extract_strided_slice %113 {offsets = [0, 384], sizes = [8, 128], strides = [1, 1]} : vector<8x512xf32> to vector<8x128xf32>
      %129 = arith.negf %128 : vector<8x128xf32>
      %130 = math.exp %129 : vector<8x128xf32>
      %cst_59 = arith.constant 1.000000e+00 : f32
      %131 = vector.broadcast %cst_59 : f32 to vector<8x128xf32>
      %132 = arith.addf %131, %130 : vector<8x128xf32>
      %133 = arith.divf %131, %132 : vector<8x128xf32>
      %134 = arith.mulf %125, %105 : vector<8x128xf32>
      %135 = arith.mulf %119, %127 : vector<8x128xf32>
      %136 = arith.addf %134, %135 : vector<8x128xf32>
      %137 = math.tanh %136 : vector<8x128xf32>
      %138 = arith.mulf %133, %137 : vector<8x128xf32>
      %139 = arith.addi %1, %c2_i32 : i32
      %140 = vector.broadcast %139 : i32 to vector<8x128xi32>
      %141 = arith.cmpi slt, %140, %19 : vector<8x128xi32>
      %142 = arith.select %141, %138, %104 : vector<8x128xi1>, vector<8x128xf32>
      %c0_60 = arith.constant 0 : index
      %c0_61 = arith.constant 0 : index
      %143 = vector.load %arg13[%c0_60, %c0_61] : memref<8x128xf32, #tpu.memory_space<vmem>>, vector<8x128xf32>
      tpu.vector_store %arg13[%c0_60, %c0_61], %142 {strides = array<i32>} : memref<8x128xf32, #tpu.memory_space<vmem>>, vector<8x128xf32>,
      %144 = arith.select %141, %136, %105 : vector<8x128xi1>, vector<8x128xf32>
      %c0_62 = arith.constant 0 : index
      %c0_63 = arith.constant 0 : index
      %145 = vector.load %arg14[%c0_62, %c0_63] : memref<8x128xf32, #tpu.memory_space<vmem>>, vector<8x128xf32>
      tpu.vector_store %arg14[%c0_62, %c0_63], %144 {strides = array<i32>} : memref<8x128xf32, #tpu.memory_space<vmem>>, vector<8x128xf32>,
      %c3_i32 = arith.constant 3 : i32
      %c0_64 = arith.constant 0 : index
      %c0_65 = arith.constant 0 : index
      %146 = vector.load %arg13[%c0_64, %c0_65] : memref<8x128xf32, #tpu.memory_space<vmem>>, vector<8x128xf32>
      %c0_66 = arith.constant 0 : index
      %c0_67 = arith.constant 0 : index
      %147 = vector.load %arg14[%c0_66, %c0_67] : memref<8x128xf32, #tpu.memory_space<vmem>>, vector<8x128xf32>
      %c8_i32_68 = arith.constant 8 : i32
      %148 = arith.muli %c3_i32, %c8_i32_68 : i32
      %149 = tpu.assume_multiple %148, 8 : i32
      %150 = arith.index_cast %149 : i32 to index
      %c0_69 = arith.constant 0 : index
      %151 = vector.load %arg15[%150, %c0_69] : memref<64x512xf32, #tpu.memory_space<vmem>>, vector<8x512xf32>
      %152 = arith.truncf %146 : vector<8x128xf32> to vector<8x128xbf16>
      %c0_70 = arith.constant 0 : index
      %c0_71 = arith.constant 0 : index
      %153 = vector.load %arg6[%c0_70, %c0_71] : memref<128x512xbf16, #tpu.memory_space<vmem>>, vector<128x512xbf16>
      %cst_72 = arith.constant dense<0.000000e+00> : vector<8x512xf32>
      %154 = tpu.matmul %152, %153, %cst_72 {dimension_numbers = #tpu.dot_dimension_numbers<[1], [0], [0], [1], [0, 0, 1, 1], [], []>} : vector<8x128xbf16>, vector<128x512xbf16>, vector<8x512xf32> -> vector<8x512xf32>
      %155 = arith.addf %151, %154 : vector<8x512xf32>
      %156 = vector.extract_strided_slice %155 {offsets = [0, 0], sizes = [8, 128], strides = [1, 1]} : vector<8x512xf32> to vector<8x128xf32>
      %157 = arith.negf %156 : vector<8x128xf32>
      %158 = math.exp %157 : vector<8x128xf32>
      %cst_73 = arith.constant 1.000000e+00 : f32
      %159 = vector.broadcast %cst_73 : f32 to vector<8x128xf32>
      %160 = arith.addf %159, %158 : vector<8x128xf32>
      %161 = arith.divf %159, %160 : vector<8x128xf32>
      %162 = vector.extract_strided_slice %155 {offsets = [0, 128], sizes = [8, 128], strides = [1, 1]} : vector<8x512xf32> to vector<8x128xf32>
      %163 = arith.negf %162 : vector<8x128xf32>
      %164 = math.exp %163 : vector<8x128xf32>
      %cst_74 = arith.constant 1.000000e+00 : f32
      %165 = vector.broadcast %cst_74 : f32 to vector<8x128xf32>
      %166 = arith.addf %165, %164 : vector<8x128xf32>
      %167 = arith.divf %165, %166 : vector<8x128xf32>
      %168 = vector.extract_strided_slice %155 {offsets = [0, 256], sizes = [8, 128], strides = [1, 1]} : vector<8x512xf32> to vector<8x128xf32>
      %169 = math.tanh %168 : vector<8x128xf32>
      %170 = vector.extract_strided_slice %155 {offsets = [0, 384], sizes = [8, 128], strides = [1, 1]} : vector<8x512xf32> to vector<8x128xf32>
      %171 = arith.negf %170 : vector<8x128xf32>
      %172 = math.exp %171 : vector<8x128xf32>
      %cst_75 = arith.constant 1.000000e+00 : f32
      %173 = vector.broadcast %cst_75 : f32 to vector<8x128xf32>
      %174 = arith.addf %173, %172 : vector<8x128xf32>
      %175 = arith.divf %173, %174 : vector<8x128xf32>
      %176 = arith.mulf %167, %147 : vector<8x128xf32>
      %177 = arith.mulf %161, %169 : vector<8x128xf32>
      %178 = arith.addf %176, %177 : vector<8x128xf32>
      %179 = math.tanh %178 : vector<8x128xf32>
      %180 = arith.mulf %175, %179 : vector<8x128xf32>
      %181 = arith.addi %1, %c3_i32 : i32
      %182 = vector.broadcast %181 : i32 to vector<8x128xi32>
      %183 = arith.cmpi slt, %182, %19 : vector<8x128xi32>
      %184 = arith.select %183, %180, %146 : vector<8x128xi1>, vector<8x128xf32>
      %c0_76 = arith.constant 0 : index
      %c0_77 = arith.constant 0 : index
      %185 = vector.load %arg13[%c0_76, %c0_77] : memref<8x128xf32, #tpu.memory_space<vmem>>, vector<8x128xf32>
      tpu.vector_store %arg13[%c0_76, %c0_77], %184 {strides = array<i32>} : memref<8x128xf32, #tpu.memory_space<vmem>>, vector<8x128xf32>,
      %186 = arith.select %183, %178, %147 : vector<8x128xi1>, vector<8x128xf32>
      %c0_78 = arith.constant 0 : index
      %c0_79 = arith.constant 0 : index
      %187 = vector.load %arg14[%c0_78, %c0_79] : memref<8x128xf32, #tpu.memory_space<vmem>>, vector<8x128xf32>
      tpu.vector_store %arg14[%c0_78, %c0_79], %186 {strides = array<i32>} : memref<8x128xf32, #tpu.memory_space<vmem>>, vector<8x128xf32>,
      %c4_i32 = arith.constant 4 : i32
      %c0_80 = arith.constant 0 : index
      %c0_81 = arith.constant 0 : index
      %188 = vector.load %arg13[%c0_80, %c0_81] : memref<8x128xf32, #tpu.memory_space<vmem>>, vector<8x128xf32>
      %c0_82 = arith.constant 0 : index
      %c0_83 = arith.constant 0 : index
      %189 = vector.load %arg14[%c0_82, %c0_83] : memref<8x128xf32, #tpu.memory_space<vmem>>, vector<8x128xf32>
      %c8_i32_84 = arith.constant 8 : i32
      %190 = arith.muli %c4_i32, %c8_i32_84 : i32
      %191 = tpu.assume_multiple %190, 8 : i32
      %192 = arith.index_cast %191 : i32 to index
      %c0_85 = arith.constant 0 : index
      %193 = vector.load %arg15[%192, %c0_85] : memref<64x512xf32, #tpu.memory_space<vmem>>, vector<8x512xf32>
      %194 = arith.truncf %188 : vector<8x128xf32> to vector<8x128xbf16>
      %c0_86 = arith.constant 0 : index
      %c0_87 = arith.constant 0 : index
      %195 = vector.load %arg6[%c0_86, %c0_87] : memref<128x512xbf16, #tpu.memory_space<vmem>>, vector<128x512xbf16>
      %cst_88 = arith.constant dense<0.000000e+00> : vector<8x512xf32>
      %196 = tpu.matmul %194, %195, %cst_88 {dimension_numbers = #tpu.dot_dimension_numbers<[1], [0], [0], [1], [0, 0, 1, 1], [], []>} : vector<8x128xbf16>, vector<128x512xbf16>, vector<8x512xf32> -> vector<8x512xf32>
      %197 = arith.addf %193, %196 : vector<8x512xf32>
      %198 = vector.extract_strided_slice %197 {offsets = [0, 0], sizes = [8, 128], strides = [1, 1]} : vector<8x512xf32> to vector<8x128xf32>
      %199 = arith.negf %198 : vector<8x128xf32>
      %200 = math.exp %199 : vector<8x128xf32>
      %cst_89 = arith.constant 1.000000e+00 : f32
      %201 = vector.broadcast %cst_89 : f32 to vector<8x128xf32>
      %202 = arith.addf %201, %200 : vector<8x128xf32>
      %203 = arith.divf %201, %202 : vector<8x128xf32>
      %204 = vector.extract_strided_slice %197 {offsets = [0, 128], sizes = [8, 128], strides = [1, 1]} : vector<8x512xf32> to vector<8x128xf32>
      %205 = arith.negf %204 : vector<8x128xf32>
      %206 = math.exp %205 : vector<8x128xf32>
      %cst_90 = arith.constant 1.000000e+00 : f32
      %207 = vector.broadcast %cst_90 : f32 to vector<8x128xf32>
      %208 = arith.addf %207, %206 : vector<8x128xf32>
      %209 = arith.divf %207, %208 : vector<8x128xf32>
      %210 = vector.extract_strided_slice %197 {offsets = [0, 256], sizes = [8, 128], strides = [1, 1]} : vector<8x512xf32> to vector<8x128xf32>
      %211 = math.tanh %210 : vector<8x128xf32>
      %212 = vector.extract_strided_slice %197 {offsets = [0, 384], sizes = [8, 128], strides = [1, 1]} : vector<8x512xf32> to vector<8x128xf32>
      %213 = arith.negf %212 : vector<8x128xf32>
      %214 = math.exp %213 : vector<8x128xf32>
      %cst_91 = arith.constant 1.000000e+00 : f32
      %215 = vector.broadcast %cst_91 : f32 to vector<8x128xf32>
      %216 = arith.addf %215, %214 : vector<8x128xf32>
      %217 = arith.divf %215, %216 : vector<8x128xf32>
      %218 = arith.mulf %209, %189 : vector<8x128xf32>
      %219 = arith.mulf %203, %211 : vector<8x128xf32>
      %220 = arith.addf %218, %219 : vector<8x128xf32>
      %221 = math.tanh %220 : vector<8x128xf32>
      %222 = arith.mulf %217, %221 : vector<8x128xf32>
      %223 = arith.addi %1, %c4_i32 : i32
      %224 = vector.broadcast %223 : i32 to vector<8x128xi32>
      %225 = arith.cmpi slt, %224, %19 : vector<8x128xi32>
      %226 = arith.select %225, %222, %188 : vector<8x128xi1>, vector<8x128xf32>
      %c0_92 = arith.constant 0 : index
      %c0_93 = arith.constant 0 : index
      %227 = vector.load %arg13[%c0_92, %c0_93] : memref<8x128xf32, #tpu.memory_space<vmem>>, vector<8x128xf32>
      tpu.vector_store %arg13[%c0_92, %c0_93], %226 {strides = array<i32>} : memref<8x128xf32, #tpu.memory_space<vmem>>, vector<8x128xf32>,
      %228 = arith.select %225, %220, %189 : vector<8x128xi1>, vector<8x128xf32>
      %c0_94 = arith.constant 0 : index
      %c0_95 = arith.constant 0 : index
      %229 = vector.load %arg14[%c0_94, %c0_95] : memref<8x128xf32, #tpu.memory_space<vmem>>, vector<8x128xf32>
      tpu.vector_store %arg14[%c0_94, %c0_95], %228 {strides = array<i32>} : memref<8x128xf32, #tpu.memory_space<vmem>>, vector<8x128xf32>,
      %c5_i32 = arith.constant 5 : i32
      %c0_96 = arith.constant 0 : index
      %c0_97 = arith.constant 0 : index
      %230 = vector.load %arg13[%c0_96, %c0_97] : memref<8x128xf32, #tpu.memory_space<vmem>>, vector<8x128xf32>
      %c0_98 = arith.constant 0 : index
      %c0_99 = arith.constant 0 : index
      %231 = vector.load %arg14[%c0_98, %c0_99] : memref<8x128xf32, #tpu.memory_space<vmem>>, vector<8x128xf32>
      %c8_i32_100 = arith.constant 8 : i32
      %232 = arith.muli %c5_i32, %c8_i32_100 : i32
      %233 = tpu.assume_multiple %232, 8 : i32
      %234 = arith.index_cast %233 : i32 to index
      %c0_101 = arith.constant 0 : index
      %235 = vector.load %arg15[%234, %c0_101] : memref<64x512xf32, #tpu.memory_space<vmem>>, vector<8x512xf32>
      %236 = arith.truncf %230 : vector<8x128xf32> to vector<8x128xbf16>
      %c0_102 = arith.constant 0 : index
      %c0_103 = arith.constant 0 : index
      %237 = vector.load %arg6[%c0_102, %c0_103] : memref<128x512xbf16, #tpu.memory_space<vmem>>, vector<128x512xbf16>
      %cst_104 = arith.constant dense<0.000000e+00> : vector<8x512xf32>
      %238 = tpu.matmul %236, %237, %cst_104 {dimension_numbers = #tpu.dot_dimension_numbers<[1], [0], [0], [1], [0, 0, 1, 1], [], []>} : vector<8x128xbf16>, vector<128x512xbf16>, vector<8x512xf32> -> vector<8x512xf32>
      %239 = arith.addf %235, %238 : vector<8x512xf32>
      %240 = vector.extract_strided_slice %239 {offsets = [0, 0], sizes = [8, 128], strides = [1, 1]} : vector<8x512xf32> to vector<8x128xf32>
      %241 = arith.negf %240 : vector<8x128xf32>
      %242 = math.exp %241 : vector<8x128xf32>
      %cst_105 = arith.constant 1.000000e+00 : f32
      %243 = vector.broadcast %cst_105 : f32 to vector<8x128xf32>
      %244 = arith.addf %243, %242 : vector<8x128xf32>
      %245 = arith.divf %243, %244 : vector<8x128xf32>
      %246 = vector.extract_strided_slice %239 {offsets = [0, 128], sizes = [8, 128], strides = [1, 1]} : vector<8x512xf32> to vector<8x128xf32>
      %247 = arith.negf %246 : vector<8x128xf32>
      %248 = math.exp %247 : vector<8x128xf32>
      %cst_106 = arith.constant 1.000000e+00 : f32
      %249 = vector.broadcast %cst_106 : f32 to vector<8x128xf32>
      %250 = arith.addf %249, %248 : vector<8x128xf32>
      %251 = arith.divf %249, %250 : vector<8x128xf32>
      %252 = vector.extract_strided_slice %239 {offsets = [0, 256], sizes = [8, 128], strides = [1, 1]} : vector<8x512xf32> to vector<8x128xf32>
      %253 = math.tanh %252 : vector<8x128xf32>
      %254 = vector.extract_strided_slice %239 {offsets = [0, 384], sizes = [8, 128], strides = [1, 1]} : vector<8x512xf32> to vector<8x128xf32>
      %255 = arith.negf %254 : vector<8x128xf32>
      %256 = math.exp %255 : vector<8x128xf32>
      %cst_107 = arith.constant 1.000000e+00 : f32
      %257 = vector.broadcast %cst_107 : f32 to vector<8x128xf32>
      %258 = arith.addf %257, %256 : vector<8x128xf32>
      %259 = arith.divf %257, %258 : vector<8x128xf32>
      %260 = arith.mulf %251, %231 : vector<8x128xf32>
      %261 = arith.mulf %245, %253 : vector<8x128xf32>
      %262 = arith.addf %260, %261 : vector<8x128xf32>
      %263 = math.tanh %262 : vector<8x128xf32>
      %264 = arith.mulf %259, %263 : vector<8x128xf32>
      %265 = arith.addi %1, %c5_i32 : i32
      %266 = vector.broadcast %265 : i32 to vector<8x128xi32>
      %267 = arith.cmpi slt, %266, %19 : vector<8x128xi32>
      %268 = arith.select %267, %264, %230 : vector<8x128xi1>, vector<8x128xf32>
      %c0_108 = arith.constant 0 : index
      %c0_109 = arith.constant 0 : index
      %269 = vector.load %arg13[%c0_108, %c0_109] : memref<8x128xf32, #tpu.memory_space<vmem>>, vector<8x128xf32>
      tpu.vector_store %arg13[%c0_108, %c0_109], %268 {strides = array<i32>} : memref<8x128xf32, #tpu.memory_space<vmem>>, vector<8x128xf32>,
      %270 = arith.select %267, %262, %231 : vector<8x128xi1>, vector<8x128xf32>
      %c0_110 = arith.constant 0 : index
      %c0_111 = arith.constant 0 : index
      %271 = vector.load %arg14[%c0_110, %c0_111] : memref<8x128xf32, #tpu.memory_space<vmem>>, vector<8x128xf32>
      tpu.vector_store %arg14[%c0_110, %c0_111], %270 {strides = array<i32>} : memref<8x128xf32, #tpu.memory_space<vmem>>, vector<8x128xf32>,
      %c6_i32 = arith.constant 6 : i32
      %c0_112 = arith.constant 0 : index
      %c0_113 = arith.constant 0 : index
      %272 = vector.load %arg13[%c0_112, %c0_113] : memref<8x128xf32, #tpu.memory_space<vmem>>, vector<8x128xf32>
      %c0_114 = arith.constant 0 : index
      %c0_115 = arith.constant 0 : index
      %273 = vector.load %arg14[%c0_114, %c0_115] : memref<8x128xf32, #tpu.memory_space<vmem>>, vector<8x128xf32>
      %c8_i32_116 = arith.constant 8 : i32
      %274 = arith.muli %c6_i32, %c8_i32_116 : i32
      %275 = tpu.assume_multiple %274, 8 : i32
      %276 = arith.index_cast %275 : i32 to index
      %c0_117 = arith.constant 0 : index
      %277 = vector.load %arg15[%276, %c0_117] : memref<64x512xf32, #tpu.memory_space<vmem>>, vector<8x512xf32>
      %278 = arith.truncf %272 : vector<8x128xf32> to vector<8x128xbf16>
      %c0_118 = arith.constant 0 : index
      %c0_119 = arith.constant 0 : index
      %279 = vector.load %arg6[%c0_118, %c0_119] : memref<128x512xbf16, #tpu.memory_space<vmem>>, vector<128x512xbf16>
      %cst_120 = arith.constant dense<0.000000e+00> : vector<8x512xf32>
      %280 = tpu.matmul %278, %279, %cst_120 {dimension_numbers = #tpu.dot_dimension_numbers<[1], [0], [0], [1], [0, 0, 1, 1], [], []>} : vector<8x128xbf16>, vector<128x512xbf16>, vector<8x512xf32> -> vector<8x512xf32>
      %281 = arith.addf %277, %280 : vector<8x512xf32>
      %282 = vector.extract_strided_slice %281 {offsets = [0, 0], sizes = [8, 128], strides = [1, 1]} : vector<8x512xf32> to vector<8x128xf32>
      %283 = arith.negf %282 : vector<8x128xf32>
      %284 = math.exp %283 : vector<8x128xf32>
      %cst_121 = arith.constant 1.000000e+00 : f32
      %285 = vector.broadcast %cst_121 : f32 to vector<8x128xf32>
      %286 = arith.addf %285, %284 : vector<8x128xf32>
      %287 = arith.divf %285, %286 : vector<8x128xf32>
      %288 = vector.extract_strided_slice %281 {offsets = [0, 128], sizes = [8, 128], strides = [1, 1]} : vector<8x512xf32> to vector<8x128xf32>
      %289 = arith.negf %288 : vector<8x128xf32>
      %290 = math.exp %289 : vector<8x128xf32>
      %cst_122 = arith.constant 1.000000e+00 : f32
      %291 = vector.broadcast %cst_122 : f32 to vector<8x128xf32>
      %292 = arith.addf %291, %290 : vector<8x128xf32>
      %293 = arith.divf %291, %292 : vector<8x128xf32>
      %294 = vector.extract_strided_slice %281 {offsets = [0, 256], sizes = [8, 128], strides = [1, 1]} : vector<8x512xf32> to vector<8x128xf32>
      %295 = math.tanh %294 : vector<8x128xf32>
      %296 = vector.extract_strided_slice %281 {offsets = [0, 384], sizes = [8, 128], strides = [1, 1]} : vector<8x512xf32> to vector<8x128xf32>
      %297 = arith.negf %296 : vector<8x128xf32>
      %298 = math.exp %297 : vector<8x128xf32>
      %cst_123 = arith.constant 1.000000e+00 : f32
      %299 = vector.broadcast %cst_123 : f32 to vector<8x128xf32>
      %300 = arith.addf %299, %298 : vector<8x128xf32>
      %301 = arith.divf %299, %300 : vector<8x128xf32>
      %302 = arith.mulf %293, %273 : vector<8x128xf32>
      %303 = arith.mulf %287, %295 : vector<8x128xf32>
      %304 = arith.addf %302, %303 : vector<8x128xf32>
      %305 = math.tanh %304 : vector<8x128xf32>
      %306 = arith.mulf %301, %305 : vector<8x128xf32>
      %307 = arith.addi %1, %c6_i32 : i32
      %308 = vector.broadcast %307 : i32 to vector<8x128xi32>
      %309 = arith.cmpi slt, %308, %19 : vector<8x128xi32>
      %310 = arith.select %309, %306, %272 : vector<8x128xi1>, vector<8x128xf32>
      %c0_124 = arith.constant 0 : index
      %c0_125 = arith.constant 0 : index
      %311 = vector.load %arg13[%c0_124, %c0_125] : memref<8x128xf32, #tpu.memory_space<vmem>>, vector<8x128xf32>
      tpu.vector_store %arg13[%c0_124, %c0_125], %310 {strides = array<i32>} : memref<8x128xf32, #tpu.memory_space<vmem>>, vector<8x128xf32>,
      %312 = arith.select %309, %304, %273 : vector<8x128xi1>, vector<8x128xf32>
      %c0_126 = arith.constant 0 : index
      %c0_127 = arith.constant 0 : index
      %313 = vector.load %arg14[%c0_126, %c0_127] : memref<8x128xf32, #tpu.memory_space<vmem>>, vector<8x128xf32>
      tpu.vector_store %arg14[%c0_126, %c0_127], %312 {strides = array<i32>} : memref<8x128xf32, #tpu.memory_space<vmem>>, vector<8x128xf32>,
      %c7_i32 = arith.constant 7 : i32
      %c0_128 = arith.constant 0 : index
      %c0_129 = arith.constant 0 : index
      %314 = vector.load %arg13[%c0_128, %c0_129] : memref<8x128xf32, #tpu.memory_space<vmem>>, vector<8x128xf32>
      %c0_130 = arith.constant 0 : index
      %c0_131 = arith.constant 0 : index
      %315 = vector.load %arg14[%c0_130, %c0_131] : memref<8x128xf32, #tpu.memory_space<vmem>>, vector<8x128xf32>
      %c8_i32_132 = arith.constant 8 : i32
      %316 = arith.muli %c7_i32, %c8_i32_132 : i32
      %317 = tpu.assume_multiple %316, 8 : i32
      %318 = arith.index_cast %317 : i32 to index
      %c0_133 = arith.constant 0 : index
      %319 = vector.load %arg15[%318, %c0_133] : memref<64x512xf32, #tpu.memory_space<vmem>>, vector<8x512xf32>
      %320 = arith.truncf %314 : vector<8x128xf32> to vector<8x128xbf16>
      %c0_134 = arith.constant 0 : index
      %c0_135 = arith.constant 0 : index
      %321 = vector.load %arg6[%c0_134, %c0_135] : memref<128x512xbf16, #tpu.memory_space<vmem>>, vector<128x512xbf16>
      %cst_136 = arith.constant dense<0.000000e+00> : vector<8x512xf32>
      %322 = tpu.matmul %320, %321, %cst_136 {dimension_numbers = #tpu.dot_dimension_numbers<[1], [0], [0], [1], [0, 0, 1, 1], [], []>} : vector<8x128xbf16>, vector<128x512xbf16>, vector<8x512xf32> -> vector<8x512xf32>
      %323 = arith.addf %319, %322 : vector<8x512xf32>
      %324 = vector.extract_strided_slice %323 {offsets = [0, 0], sizes = [8, 128], strides = [1, 1]} : vector<8x512xf32> to vector<8x128xf32>
      %325 = arith.negf %324 : vector<8x128xf32>
      %326 = math.exp %325 : vector<8x128xf32>
      %cst_137 = arith.constant 1.000000e+00 : f32
      %327 = vector.broadcast %cst_137 : f32 to vector<8x128xf32>
      %328 = arith.addf %327, %326 : vector<8x128xf32>
      %329 = arith.divf %327, %328 : vector<8x128xf32>
      %330 = vector.extract_strided_slice %323 {offsets = [0, 128], sizes = [8, 128], strides = [1, 1]} : vector<8x512xf32> to vector<8x128xf32>
      %331 = arith.negf %330 : vector<8x128xf32>
      %332 = math.exp %331 : vector<8x128xf32>
      %cst_138 = arith.constant 1.000000e+00 : f32
      %333 = vector.broadcast %cst_138 : f32 to vector<8x128xf32>
      %334 = arith.addf %333, %332 : vector<8x128xf32>
      %335 = arith.divf %333, %334 : vector<8x128xf32>
      %336 = vector.extract_strided_slice %323 {offsets = [0, 256], sizes = [8, 128], strides = [1, 1]} : vector<8x512xf32> to vector<8x128xf32>
      %337 = math.tanh %336 : vector<8x128xf32>
      %338 = vector.extract_strided_slice %323 {offsets = [0, 384], sizes = [8, 128], strides = [1, 1]} : vector<8x512xf32> to vector<8x128xf32>
      %339 = arith.negf %338 : vector<8x128xf32>
      %340 = math.exp %339 : vector<8x128xf32>
      %cst_139 = arith.constant 1.000000e+00 : f32
      %341 = vector.broadcast %cst_139 : f32 to vector<8x128xf32>
      %342 = arith.addf %341, %340 : vector<8x128xf32>
      %343 = arith.divf %341, %342 : vector<8x128xf32>
      %344 = arith.mulf %335, %315 : vector<8x128xf32>
      %345 = arith.mulf %329, %337 : vector<8x128xf32>
      %346 = arith.addf %344, %345 : vector<8x128xf32>
      %347 = math.tanh %346 : vector<8x128xf32>
      %348 = arith.mulf %343, %347 : vector<8x128xf32>
      %349 = arith.addi %1, %c7_i32 : i32
      %350 = vector.broadcast %349 : i32 to vector<8x128xi32>
      %351 = arith.cmpi slt, %350, %19 : vector<8x128xi32>
      %352 = arith.select %351, %348, %314 : vector<8x128xi1>, vector<8x128xf32>
      %c0_140 = arith.constant 0 : index
      %c0_141 = arith.constant 0 : index
      %353 = vector.load %arg13[%c0_140, %c0_141] : memref<8x128xf32, #tpu.memory_space<vmem>>, vector<8x128xf32>
      tpu.vector_store %arg13[%c0_140, %c0_141], %352 {strides = array<i32>} : memref<8x128xf32, #tpu.memory_space<vmem>>, vector<8x128xf32>,
      %354 = arith.select %351, %346, %315 : vector<8x128xi1>, vector<8x128xf32>
      %c0_142 = arith.constant 0 : index
      %c0_143 = arith.constant 0 : index
      %355 = vector.load %arg14[%c0_142, %c0_143] : memref<8x128xf32, #tpu.memory_space<vmem>>, vector<8x128xf32>
      tpu.vector_store %arg14[%c0_142, %c0_143], %354 {strides = array<i32>} : memref<8x128xf32, #tpu.memory_space<vmem>>, vector<8x128xf32>,
      %c8_i32_144 = arith.constant 8 : i32
    } else {
    }
    %c0_i32_2 = arith.constant 0 : i32
    %8 = arith.cmpi eq, %arg1, %c0_i32_2 : i32
    %9 = arith.extui %8 : i1 to i32
    %c0_i32_3 = arith.constant 0 : i32
    %10 = arith.cmpi ne, %9, %c0_i32_3 : i32
    scf.if %10 {
      %c0_4 = arith.constant 0 : index
      %c0_5 = arith.constant 0 : index
      %11 = vector.load %arg13[%c0_4, %c0_5] : memref<8x128xf32, #tpu.memory_space<vmem>>, vector<8x128xf32>
      %12 = arith.truncf %11 : vector<8x128xf32> to vector<8x128xbf16>
      %c0_6 = arith.constant 0 : index
      %c0_7 = arith.constant 0 : index
      %13 = vector.load %arg10[%c0_6, %c0_7] : memref<128x128xbf16, #tpu.memory_space<vmem>>, vector<128x128xbf16>
      %cst = arith.constant dense<0.000000e+00> : vector<8x128xf32>
      %14 = tpu.matmul %12, %13, %cst {dimension_numbers = #tpu.dot_dimension_numbers<[1], [0], [0], [1], [0, 0, 1, 1], [], []>} : vector<8x128xbf16>, vector<128x128xbf16>, vector<8x128xf32> -> vector<8x128xf32>
      %c0_8 = arith.constant 0 : index
      %c0_9 = arith.constant 0 : index
      %15 = vector.load %arg11[%c0_8, %c0_9] : memref<1x128xf32, #tpu.memory_space<vmem>>, vector<1x128xf32>
      %16 = vector.broadcast %15 : vector<1x128xf32> to vector<8x128xf32>
      %17 = arith.addf %14, %16 : vector<8x128xf32>
      %cst_10 = arith.constant dense<0xFF800000> : vector<8xf32>
      %18 = vector.multi_reduction <maximumf>, %17, %cst_10 [1] : vector<8x128xf32> to vector<8xf32>
      %19 = vector.shape_cast %18 : vector<8xf32> to vector<8x1xf32>
      %20 = vector.broadcast %19 : vector<8x1xf32> to vector<8x128xf32>
      %21 = arith.subf %17, %20 : vector<8x128xf32>
      %22 = math.exp %21 : vector<8x128xf32>
      %cst_11 = arith.constant dense<0.000000e+00> : vector<8xf32>
      %23 = vector.multi_reduction <add>, %22, %cst_11 [1] : vector<8x128xf32> to vector<8xf32>
      %24 = vector.shape_cast %23 : vector<8xf32> to vector<8x1xf32>
      %25 = math.log %24 : vector<8x1xf32>
      %26 = vector.broadcast %25 : vector<8x1xf32> to vector<8x128xf32>
      %27 = arith.subf %21, %26 : vector<8x128xf32>
      %c0_12 = arith.constant 0 : index
      %c0_13 = arith.constant 0 : index
      %28 = vector.load %arg12[%c0_12, %c0_13] : memref<8x128xf32, #tpu.memory_space<vmem>>, vector<8x128xf32>
      tpu.vector_store %arg12[%c0_12, %c0_13], %27 {strides = array<i32>} : memref<8x128xf32, #tpu.memory_space<vmem>>, vector<8x128xf32>,
    } else {
    }
    return
  }
  func.func @transform_0(%arg0: i32, %arg1: i32, %arg2: memref<1xi32, #tpu.memory_space<smem>>) -> (i32, i32) {
    %c0_i32 = arith.constant 0 : i32
    %c0_i32_0 = arith.constant 0 : i32
    return %arg0, %c0_i32 : i32, i32
  }
  func.func @transform_1(%arg0: i32, %arg1: i32, %arg2: memref<1xi32, #tpu.memory_space<smem>>) -> (i32, i32, i32) {
    %c0_i32 = arith.constant 0 : i32
    %c0_i32_0 = arith.constant 0 : i32
    return %arg1, %arg0, %c0_i32 : i32, i32, i32
  }
  func.func @transform_2(%arg0: i32, %arg1: i32, %arg2: memref<1xi32, #tpu.memory_space<smem>>) -> (i32, i32) {
    %c0_i32 = arith.constant 0 : i32
    %c0_i32_0 = arith.constant 0 : i32
    %c0_i32_1 = arith.constant 0 : i32
    return %c0_i32, %c0_i32_0 : i32, i32
  }
  func.func @transform_3(%arg0: i32, %arg1: i32, %arg2: memref<1xi32, #tpu.memory_space<smem>>) -> (i32, i32) {
    %c0_i32 = arith.constant 0 : i32
    %c0_i32_0 = arith.constant 0 : i32
    %c0_i32_1 = arith.constant 0 : i32
    return %c0_i32, %c0_i32_0 : i32, i32
  }
  func.func @transform_4(%arg0: i32, %arg1: i32, %arg2: memref<1xi32, #tpu.memory_space<smem>>) -> (i32, i32) {
    %c0_i32 = arith.constant 0 : i32
    %c0_i32_0 = arith.constant 0 : i32
    %c0_i32_1 = arith.constant 0 : i32
    return %c0_i32, %c0_i32_0 : i32, i32
  }
  func.func @transform_5(%arg0: i32, %arg1: i32, %arg2: memref<1xi32, #tpu.memory_space<smem>>) -> (i32, i32) {
    %c0_i32 = arith.constant 0 : i32
    %c0_i32_0 = arith.constant 0 : i32
    return %arg0, %c0_i32 : i32, i32
  }
  func.func @transform_6(%arg0: i32, %arg1: i32, %arg2: memref<1xi32, #tpu.memory_space<smem>>) -> (i32, i32) {
    %c0_i32 = arith.constant 0 : i32
    %c0_i32_0 = arith.constant 0 : i32
    return %arg0, %c0_i32 : i32, i32
  }
  func.func @transform_7(%arg0: i32, %arg1: i32, %arg2: memref<1xi32, #tpu.memory_space<smem>>) -> (i32, i32) {
    %c0_i32 = arith.constant 0 : i32
    %c0_i32_0 = arith.constant 0 : i32
    %c0_i32_1 = arith.constant 0 : i32
    return %c0_i32, %c0_i32_0 : i32, i32
  }
  func.func @transform_8(%arg0: i32, %arg1: i32, %arg2: memref<1xi32, #tpu.memory_space<smem>>) -> (i32, i32) {
    %c0_i32 = arith.constant 0 : i32
    %c0_i32_0 = arith.constant 0 : i32
    %c0_i32_1 = arith.constant 0 : i32
    return %c0_i32, %c0_i32_0 : i32, i32
  }
  func.func @transform_9(%arg0: i32, %arg1: i32, %arg2: memref<1xi32, #tpu.memory_space<smem>>) -> (i32, i32) {
    %c0_i32 = arith.constant 0 : i32
    %c0_i32_0 = arith.constant 0 : i32
    return %arg0, %c0_i32 : i32, i32
  }
}

</mosaic_0001>

<bundles_post_ra>
// kernel: tpu_custom_call.1
= control target key start
LH: loop header
LB: loop body
LE: loop exit
PB: predicated region body
PF: predicated region fallthrough
CT: control target
= control target key end

     0   :  { %16 = vsyncpa [#allocation8], 0  ;;  %s4812_s0 = inlined_call_operand.<no memory space> [shape: s32[1], index: 0, kind: input, shape index: {}]   ;;  %s4813_s1 = inlined_call_operand.hbm [shape: s32[8,128], index: 1, kind: input, shape index: {}]   ;;  %s4814_s2 = inlined_call_operand.hbm [shape: bf16[8,8,128], index: 2, kind: input, shape index: {}]   ;;  %s4815_s3 = inlined_call_operand.hbm [shape: bf16[128,512], index: 3, kind: input, shape index: {}]   ;;  %s4816_s4 = inlined_call_operand.hbm [shape: bf16[128,512], index: 4, kind: input, shape index: {}]   ;;  %s4817_s5 = inlined_call_operand.hbm [shape: f32[1,512], index: 5, kind: input, shape index: {}]   ;;  %s4818_s6 = inlined_call_operand.vmem [shape: f32[8,128], index: 6, kind: input, shape index: {}]   ;;  %s4819_s7 = inlined_call_operand.hbm [shape: f32[8,128], index: 7, kind: input, shape index: {}]   ;;  %s4820_s8 = inlined_call_operand.hbm [shape: bf16[128,128], index: 8, kind: input, shape index: {}]   ;;  %s4821_s9 = inlined_call_operand.vmem [shape: f32[1,128], index: 9, kind: input, shape index: {}]   ;;  %s4822_s10 = inlined_call_operand.hbm [shape: f32[8,128], index: 10, kind: output, shape index: {}]  }
   0x1   :  { %17 = vsyncpa [#allocation11], 0 }
   0x2   :  { %18 = vsyncpa [#allocation14], 0 }
   0x3   :  { %19 = vsyncpa [#allocation17], 0 }
   0x4   :  { %20 = vsyncpa [#allocation9], 0  ;;  %s4105_s13 = smov [#allocation10]  }
   0x5   :  { %s36_s14 = sshll.u32 %s4105_s13, 4  ;;  %s37_s14 = int_to_ptr.vmem [resolvable:$true] %s36_s14 }
   0x6   :  { %s3943_s15 = scalar_lea.vmem %s37_s14, 512  ;;  %p3948_p1 = scmp.lt.s32.totalorder %s37_s14, %s37_s14 }
   0x7   :  { %p3944_p0 = scmp.ne.s32.totalorder %s37_s14, %s3943_s15  ;;  %p3949_p2 = scmp.lt.s32.totalorder %s3943_s15, %s3943_s15 }
   0x9   :  { %p3950_p3 = por %p3949_p2, %p3948_p1 }
   0xb   :  { %p3951_p4 = pnand %p3950_p3, %p3944_p0 }
   0xd   :  { %3954 = shalt.err (!%p3951_p4)
}
   0xe   :  { %s4106_s16 = smov 64   ;;  %s4107_s17 = smov 4  }
   0xf   :  { %42 = dma.hbm_to_vmem [thread:$0]  %s4814_s2, 512, %s37_s14, [#allocation11], %s4106_s16, %s4106_s16, %s4107_s17  }
  0x10   :  { %s4108_s20 = smov [#allocation13]   ;;  %s4109_s22 = smov [#allocation16]  }
  0x11   :  { %s60_s21 = sshll.u32 %s4108_s20, 4  ;;  %s85_s23 = sshll.u32 %s4109_s22, 4  ;;  %s61_s21 = int_to_ptr.vmem [resolvable:$true] %s60_s21  ;;  %s86_s23 = int_to_ptr.vmem [resolvable:$true] %s85_s23 }
  0x12   :  { %s3963_s24 = scalar_lea.vmem %s61_s21, 4096  ;;  %p3968_p6 = scmp.lt.s32.totalorder %s61_s21, %s61_s21 }
  0x13   :  { %p3964_p5 = scmp.ne.s32.totalorder %s61_s21, %s3963_s24  ;;  %p3969_p7 = scmp.lt.s32.totalorder %s3963_s24, %s3963_s24 }
  0x15   :  { %p3970_p8 = por %p3969_p7, %p3968_p6 }
  0x17   :  { %p3971_p9 = pnand %p3970_p8, %p3964_p5 }
  0x19   :  { %3974 = shalt.err (!%p3971_p9)
}
  0x1a   :  { %s4110_s25 = smov 256   ;;  %s4111_s26 = smov 16  }
  0x1b   :  { %66 = dma.hbm_to_vmem [thread:$0]  %s4816_s4, 4096, %s61_s21, [#allocation14], %s4110_s25, %s4110_s25, %s4111_s26  }
  0x1c   :  { %s3983_s2 = scalar_lea.vmem %s86_s23, 128  ;;  %p3988_p11 = scmp.lt.s32.totalorder %s86_s23, %s86_s23 }
  0x1d   :  { %p3984_p10 = scmp.ne.s32.totalorder %s86_s23, %s3983_s2  ;;  %p3989_p12 = scmp.lt.s32.totalorder %s3983_s2, %s3983_s2 }
  0x1f   :  { %p3990_p13 = por %p3989_p12, %p3988_p11 }
  0x21   :  { %p3991_p0 = pnand %p3990_p13, %p3984_p10 }
  0x23   :  { %3994 = shalt.err (!%p3991_p0)
}
  0x24   :  { %88 = dma.hbm_to_vmem [thread:$0]  %s4819_s7, 128, %s86_s23, [#allocation17]  }
  0x25   :  { %s4112_s11 = smov [#allocation7]   ;;  %s4113_s13 = smov [#allocation12]  }
  0x26   :  { %s27_s12 = sshll.u32 %s4112_s11, 4  ;;  %s48_s14 = sshll.u32 %s4113_s13, 4  ;;  %s28_s12 = int_to_ptr.vmem [resolvable:$true] %s27_s12  ;;  %s49_s14 = int_to_ptr.vmem [resolvable:$true] %s48_s14 }
  0x27   :  { %s4003_s15 = scalar_lea.vmem %s28_s12, 128  ;;  %p4008_p2 = scmp.lt.s32.totalorder %s28_s12, %s28_s12 }
  0x28   :  { %p4004_p1 = scmp.ne.s32.totalorder %s28_s12, %s4003_s15  ;;  %p4009_p3 = scmp.lt.s32.totalorder %s4003_s15, %s4003_s15 }
  0x2a   :  { %p4010_p4 = por %p4009_p3, %p4008_p2 }
  0x2c   :  { %p4011_p5 = pnand %p4010_p4, %p4004_p1 }
  0x2e   :  { %4014 = shalt.err (!%p4011_p5)
}
  0x2f   :  { %30 = dma.hbm_to_vmem [thread:$0]  %s4813_s1, 128, %s28_s12, [#allocation8]  }
  0x30   :  { %s4023_s19 = scalar_lea.vmem %s49_s14, 4096  ;;  %p4028_p7 = scmp.lt.s32.totalorder %s49_s14, %s49_s14 }
  0x31   :  { %p4024_p6 = scmp.ne.s32.totalorder %s49_s14, %s4023_s19  ;;  %p4029_p8 = scmp.lt.s32.totalorder %s4023_s19, %s4023_s19 }
  0x33   :  { %p4030_p9 = por %p4029_p8, %p4028_p7 }
  0x35   :  { %p4031_p10 = pnand %p4030_p9, %p4024_p6 }
  0x37   :  { %4034 = shalt.err (!%p4031_p10)
}
  0x38   :  { %54 = dma.hbm_to_vmem [thread:$0]  %s4815_s3, 4096, %s49_s14, [#allocation11], %s4110_s25, %s4110_s25, %s4111_s26  }
  0x39   :  { %s4114_s21 = smov [#allocation15]   ;;  %s4115_s23 = smov [#allocation18]  }
  0x3a   :  { %s73_s22 = sshll.u32 %s4114_s21, 4  ;;  %s94_s1 = sshll.u32 %s4115_s23, 4  ;;  %s74_s22 = int_to_ptr.vmem [resolvable:$true] %s73_s22  ;;  %s95_s1 = int_to_ptr.vmem [resolvable:$true] %s94_s1 }
  0x3b   :  { %s4043_s24 = scalar_lea.vmem %s74_s22, 64  ;;  %p4048_p12 = scmp.lt.s32.totalorder %s74_s22, %s74_s22 }
  0x3c   :  { %p4044_p11 = scmp.ne.s32.totalorder %s74_s22, %s4043_s24  ;;  %p4049_p13 = scmp.lt.s32.totalorder %s4043_s24, %s4043_s24 }
  0x3e   :  { %p4050_p0 = por %p4049_p13, %p4048_p12 }
  0x40   :  { %p4051_p1 = pnand %p4050_p0, %p4044_p11 }
  0x42   :  { %4054 = shalt.err (!%p4051_p1)
}
  0x43   :  { %76 = dma.hbm_to_vmem [thread:$0]  %s4817_s5, 64, %s74_s22, [#allocation14]  }
  0x44   :  { %s4063_s2 = scalar_lea.vmem %s95_s1, 1024  ;;  %p4068_p3 = scmp.lt.s32.totalorder %s95_s1, %s95_s1 }
  0x45   :  { %p4064_p2 = scmp.ne.s32.totalorder %s95_s1, %s4063_s2  ;;  %p4069_p4 = scmp.lt.s32.totalorder %s4063_s2, %s4063_s2 }
  0x47   :  { %p4070_p5 = por %p4069_p4, %p4068_p3 }
  0x49   :  { %p4071_p6 = pnand %p4070_p5, %p4064_p2 }
  0x4b   :  { %4074 = shalt.err (!%p4071_p6)
}
  0x4c   :  { %100 = dma.hbm_to_vmem [thread:$0]  %s4820_s8, 1024, %s95_s1, [#allocation17], %s4106_s16, %s4106_s16, %s4107_s17  }
  0x4d   :  { %4095 = dma.done.wait [#allocation8], 128  }
  0x4e   :  { %4096 = vsyncadd [#allocation8], 4294967168 }
  0x4f   :  { %4097 = dma.done.wait [#allocation11], 4608  }
  0x50   :  { %4098 = vsyncadd [#allocation11], 4294962688 }
  0x51   :  { %4099 = dma.done.wait [#allocation14], 4160  }
  0x52   :  { %4100 = vsyncadd [#allocation14], 4294963136 }
  0x53   :  { %4101 = dma.done.wait [#allocation17], 1152  }
  0x54   :  { %4102 = vsyncadd [#allocation17], 4294966144  ;;  %v131_v0 = vld [vmem:[%s4818_s6] sm:$0xff]  ;;  %p3268_p7 = scmp.le.s32.totalorder %s4812_s0, 0 }
  0x55   :  { %v133_v1 = vld [vmem:[#allocation16] sm:$0xff]  ;;  %132 = vst [vmem:[#allocation2] sm:$0xff] %v131_v0 }
  0x56   :  { %134 = vst [vmem:[#allocation3] sm:$0xff] %v133_v1  ;;  %138 = sbr.rel (%p3268_p7) target bundleno = 2172 (0x87c), region = 73 }
  0x5b   :  { %v3646_v2 = vld [vmem:[#allocation12 + $0xe4] ss:$16 sps:$4 sm:$0xff]   ;;  %v3648_v3 = vld [vmem:[#allocation12 + $0xec] ss:$16 sps:$4 sm:$0xff]   ;;  %v4823_v4 = vmov 0  }
  0x5c   :  { %417 = vmatprep.mubr.bf16.mxu0 %v4823_v4  ;;  %490 = vmatprep.mubr.bf16.mxu1 %v4823_v4  ;;  %v3650_v5 = vld [vmem:[#allocation12 + $0xe0] ss:$16 sps:$4 sm:$0xff]   ;;  %v3651_v6 = vld [vmem:[#allocation12 + $0xe8] ss:$16 sps:$4 sm:$0xff]   ;;  %v3652_v7 = vld [vmem:[#allocation12 + $0xc4] ss:$16 sps:$4 sm:$0xff]  }
  0x5d   :  { %385 = vmatprep.subr.bf16.mxu0 %v3646_v2  ;;  %458 = vmatprep.subr.bf16.mxu1 %v3648_v3  ;;  %v3654_v8 = vld [vmem:[#allocation12 + $0xcc] ss:$16 sps:$4 sm:$0xff]   ;;  %v3656_v9 = vld [vmem:[#allocation12 + $0xc0] ss:$16 sps:$4 sm:$0xff]   ;;  %v3657_v10 = vld [vmem:[#allocation12 + $0xc8] ss:$16 sps:$4 sm:$0xff]  }
  0x5e   :  { %386 = vmatpush1.bf16.msra.mxu0 %v3650_v5  ;;  %459 = vmatpush1.bf16.msra.mxu1 %v3651_v6  ;;  %v3658_v11 = vld [vmem:[#allocation12 + $0xa4] ss:$16 sps:$4 sm:$0xff]   ;;  %v3660_v12 = vld [vmem:[#allocation12 + $0xac] ss:$16 sps:$4 sm:$0xff]   ;;  %v3662_v13 = vld [vmem:[#allocation12 + $0xa0] ss:$16 sps:$4 sm:$0xff]  }
  0x5f   :  { %387 = vmatprep.subr.bf16.mxu0 %v3652_v7  ;;  %460 = vmatprep.subr.bf16.mxu1 %v3654_v8  ;;  %v3663_v14 = vld [vmem:[#allocation12 + $0xa8] ss:$16 sps:$4 sm:$0xff]   ;;  %v3664_v15 = vld [vmem:[#allocation12 + $0x84] ss:$16 sps:$4 sm:$0xff]   ;;  %v3666_v16 = vld [vmem:[#allocation12 + $0x8c] ss:$16 sps:$4 sm:$0xff]  }
  0x60   :  { %v3668_v17 = vld [vmem:[#allocation12 + $0x80] ss:$16 sps:$4 sm:$0xff]   ;;  %v3669_v18 = vld [vmem:[#allocation12 + $0x88] ss:$16 sps:$4 sm:$0xff]   ;;  %v3670_v19 = vld [vmem:[#allocation12 + $0x64] ss:$16 sps:$4 sm:$0xff]  }
  0x61   :  { %v3672_v20 = vld [vmem:[#allocation12 + $0x6c] ss:$16 sps:$4 sm:$0xff]   ;;  %v3674_v21 = vld [vmem:[#allocation12 + $0x60] ss:$16 sps:$4 sm:$0xff]   ;;  %v3675_v22 = vld [vmem:[#allocation12 + $0x68] ss:$16 sps:$4 sm:$0xff]  }
  0x62   :  { %388 = vmatpush1.bf16.msra.mxu0 %v3656_v9  ;;  %461 = vmatpush1.bf16.msra.mxu1 %v3657_v10  ;;  %v3676_v23 = vld [vmem:[#allocation12 + $0x44] ss:$16 sps:$4 sm:$0xff]   ;;  %v3678_v24 = vld [vmem:[#allocation12 + $0x4c] ss:$16 sps:$4 sm:$0xff]   ;;  %v3680_v25 = vld [vmem:[#allocation12 + $0x40] ss:$16 sps:$4 sm:$0xff]   ;;  %v181_v10 = vlaneseq }
  0x63   :  { %389 = vmatprep.subr.bf16.mxu0 %v3658_v11  ;;  %462 = vmatprep.subr.bf16.mxu1 %v3660_v12  ;;  %v3681_v26 = vld [vmem:[#allocation12 + $0x48] ss:$16 sps:$4 sm:$0xff]   ;;  %v3682_v27 = vld [vmem:[#allocation12 + $0x24] ss:$16 sps:$4 sm:$0xff]   ;;  %v3684_v28 = vld [vmem:[#allocation12 + $0x2c] ss:$16 sps:$4 sm:$0xff]  }
  0x64   :  { %v3686_v29 = vld [vmem:[#allocation12 + $0x20] ss:$16 sps:$4 sm:$0xff]   ;;  %v3687_v30 = vld [vmem:[#allocation12 + $0x28] ss:$16 sps:$4 sm:$0xff]   ;;  %v3688_v31 = vld [vmem:[#allocation12 + $0x4] ss:$16 sps:$4 sm:$0xff]  }
  0x65   :  { %v3690_v32 = vld [vmem:[#allocation12 + $0xc] ss:$16 sps:$4 sm:$0xff]   ;;  %v3692_v33 = vld [vmem:[#allocation12] ss:$16 sps:$4 sm:$0xff]   ;;  %v3693_v34 = vld [vmem:[#allocation12 + $0x8] ss:$16 sps:$4 sm:$0xff]  }
  0x66   :  { %390 = vmatpush1.bf16.msra.mxu0 %v3662_v13  ;;  %463 = vmatpush1.bf16.msra.mxu1 %v3663_v14  ;;  %v4216_v35 = vld [vmem:[#allocation13 + $0xe4] ss:$16 sps:$4 sm:$0xff]   ;;  %v4218_v36 = vld [vmem:[#allocation13 + $0xec] ss:$16 sps:$4 sm:$0xff]   ;;  %v4220_v38 = vld [vmem:[#allocation13 + $0xe0] ss:$16 sps:$4 sm:$0xff]  }
  0x67   :  { %391 = vmatprep.subr.bf16.mxu0 %v3664_v15  ;;  %464 = vmatprep.subr.bf16.mxu1 %v3666_v16  ;;  %v3694_v37 = vld [vmem:[#allocation10] sm:$0xff]   ;;  %v4222_v39 = vld [vmem:[#allocation13 + $0xe8] ss:$16 sps:$4 sm:$0xff]   ;;  %v4228_v41 = vld [vmem:[#allocation13 + $0xcc] ss:$16 sps:$4 sm:$0xff]   ;;  %v182_v11 = vshrl.u32 %v181_v10, 7 }
  0x68   :  { %v4226_v40 = vld [vmem:[#allocation13 + $0xc4] ss:$16 sps:$4 sm:$0xff]   ;;  %v4230_v42 = vld [vmem:[#allocation13 + $0xc0] ss:$16 sps:$4 sm:$0xff]   ;;  %v4234_v43 = vld [vmem:[#allocation13 + $0xc8] ss:$16 sps:$4 sm:$0xff]  }
  0x69   :  { %v4238_v44 = vld [vmem:[#allocation13 + $0xa4] ss:$16 sps:$4 sm:$0xff]   ;;  %v4240_v45 = vld [vmem:[#allocation13 + $0xac] ss:$16 sps:$4 sm:$0xff]   ;;  %v4244_v47 = vld [vmem:[#allocation13 + $0xa0] ss:$16 sps:$4 sm:$0xff]  }
  0x6a   :  { %392 = vmatpush1.bf16.msra.mxu0 %v3668_v17  ;;  %465 = vmatpush1.bf16.msra.mxu1 %v3669_v18  ;;  %v3707_v46 = vld [vmem:[#allocation10 + $0x8] sm:$0xff]   ;;  %v4250_v49 = vld [vmem:[#allocation13 + $0x84] ss:$16 sps:$4 sm:$0xff]   ;;  %v4256_v51 = vld [vmem:[#allocation13 + $0x80] ss:$16 sps:$4 sm:$0xff]   ;;  %v191_v12 = vsub.s32 2, %v182_v11 }
  0x6b   :  { %393 = vmatprep.subr.bf16.mxu0 %v3670_v19  ;;  %466 = vmatprep.subr.bf16.mxu1 %v3672_v20  ;;  %v4246_v48 = vld [vmem:[#allocation13 + $0xa8] ss:$16 sps:$4 sm:$0xff]   ;;  %v4254_v50 = vld [vmem:[#allocation13 + $0x8c] ss:$16 sps:$4 sm:$0xff]   ;;  %v4262_v53 = vld [vmem:[#allocation13 + $0x64] ss:$16 sps:$4 sm:$0xff]  }
  0x6c   :  { %v4258_v52 = vld [vmem:[#allocation13 + $0x88] ss:$16 sps:$4 sm:$0xff]   ;;  %v4266_v54 = vld [vmem:[#allocation13 + $0x6c] ss:$16 sps:$4 sm:$0xff]   ;;  %v3720_v55 = vld [vmem:[#allocation10 + $0x10] sm:$0xff]   ;;  %v183_v13 = vsub.s32 0, %v182_v11 }
  0x6d   :  { %v4270_v56 = vld [vmem:[#allocation13 + $0x60] ss:$16 sps:$4 sm:$0xff]   ;;  %v4272_v57 = vld [vmem:[#allocation13 + $0x68] ss:$16 sps:$4 sm:$0xff]   ;;  %v4274_v58 = vld [vmem:[#allocation13 + $0x44] ss:$16 sps:$4 sm:$0xff]  }
  0x6e   :  { %394 = vmatpush1.bf16.msra.mxu0 %v3674_v21  ;;  %467 = vmatpush1.bf16.msra.mxu1 %v3675_v22  ;;  %v4276_v59 = vld [vmem:[#allocation13 + $0x4c] ss:$16 sps:$4 sm:$0xff]   ;;  %v4282_v60 = vld [vmem:[#allocation13 + $0x40] ss:$16 sps:$4 sm:$0xff]   ;;  %v4284_v61 = vld [vmem:[#allocation13 + $0x48] ss:$16 sps:$4 sm:$0xff]  }
  0x6f   :  { %395 = vmatprep.subr.bf16.mxu0 %v3676_v23  ;;  %468 = vmatprep.subr.bf16.mxu1 %v3678_v24  ;;  %v4286_v62 = vld [vmem:[#allocation13 + $0x24] ss:$16 sps:$4 sm:$0xff]   ;;  %v4288_v63 = vld [vmem:[#allocation13 + $0x2c] ss:$16 sps:$4 sm:$0xff]   ;;  %v4296_v1 = vld [vmem:[#allocation13 + $0x20] ss:$16 sps:$4 sm:$0xff]  }
  0x70   :  { %v3733_v0 = vld [vmem:[#allocation10 + $0x18] sm:$0xff]   ;;  %v4300_v3 = vld [vmem:[#allocation13 + $0x4] ss:$16 sps:$4 sm:$0xff]   ;;  %v4310_v6 = vld [vmem:[#allocation13] ss:$16 sps:$4 sm:$0xff]   ;;  %v195_v14 = vsub.s32 3, %v182_v11 }
  0x71   :  { %v4298_v2 = vld [vmem:[#allocation13 + $0x28] ss:$16 sps:$4 sm:$0xff]   ;;  %v4302_v5 = vld [vmem:[#allocation13 + $0xc] ss:$16 sps:$4 sm:$0xff]   ;;  %v179_v15 = vld [vmem:[#allocation15] sm:$0xf] }
  0x72   :  { %396 = vmatpush1.bf16.msra.mxu0 %v3680_v25  ;;  %469 = vmatpush1.bf16.msra.mxu1 %v3681_v26  ;;  %v4312_v7 = vld [vmem:[#allocation13 + $0x8] ss:$16 sps:$4 sm:$0xff]   ;;  %v4364_v18 = vrot.slane %v179_v15, %v191_v12  ;;  %v187_v19 = vsub.s32 1, %v182_v11  ;;  %v184_v22 = vrot.slane %v179_v15, %v183_v13  ;;  %v4370_v23 = vrot.slane %v179_v15, %v195_v14 }
  0x73   :  { %397 = vmatprep.subr.bf16.mxu0 %v3682_v27  ;;  %470 = vmatprep.subr.bf16.mxu1 %v3684_v28  ;;  %v4314_v8 = vld [vmem:[#allocation2] sm:$0xff] }
  0x74   :  { %v573_v9 = vpack.c.bf16 %v4314_v8, %v4314_v8  ;;  %v188_v26 = vrot.slane %v179_v15, %v187_v19 }
  0x76   :  { %398 = vmatpush1.bf16.msra.mxu0 %v3686_v29  ;;  %471 = vmatpush1.bf16.msra.mxu1 %v3687_v30 }
  0x77   :  { %399 = vmatprep.subr.bf16.mxu0 %v3688_v31  ;;  %472 = vmatprep.subr.bf16.mxu1 %v3690_v32 }
  0x7a   :  { %400 = vmatpush1.bf16.msra.mxu0 %v3692_v33  ;;  %473 = vmatpush1.bf16.msra.mxu1 %v3693_v34 }
  0x7b   :  { %766 = vmatprep.subr.bf16.mxu0 %v4216_v35  ;;  %807 = vmatprep.subr.bf16.mxu1 %v4218_v36 }
  0x7d   :  { %418 = vmatmul.mubr.bf16.vlgmr.msra.gmra.mxu0 %v3694_v37  ;;  %491 = vmatmul.mubr.bf16.vlgmr.msra.gmra.mxu1 %v3694_v37 }
  0x7e   :  { %767 = vmatpush1.bf16.msra.mxu0 %v4220_v38  ;;  %808 = vmatpush1.bf16.msra.mxu1 %v4222_v39 }
  0x7f   :  { %768 = vmatprep.subr.bf16.mxu0 %v4226_v40  ;;  %809 = vmatprep.subr.bf16.mxu1 %v4228_v41 }
  0x80   :  { %427 = vmatprep.mubr.bf16.mxu0 %v4823_v4  ;;  %500 = vmatprep.mubr.bf16.mxu1 %v4823_v4 }
  0x82   :  { %769 = vmatpush1.bf16.msra.mxu0 %v4230_v42  ;;  %810 = vmatpush1.bf16.msra.mxu1 %v4234_v43 }
  0x83   :  { %770 = vmatprep.subr.bf16.mxu0 %v4238_v44  ;;  %811 = vmatprep.subr.bf16.mxu1 %v4240_v45 }
  0x85   :  { %428 = vmatmul.mubr.bf16.gmra.mxu0 %v3707_v46  ;;  %501 = vmatmul.mubr.bf16.gmra.mxu1 %v3707_v46 }
  0x86   :  { %771 = vmatpush1.bf16.msra.mxu0 %v4244_v47  ;;  %812 = vmatpush1.bf16.msra.mxu1 %v4246_v48 }
  0x87   :  { %772 = vmatprep.subr.bf16.mxu0 %v4250_v49  ;;  %813 = vmatprep.subr.bf16.mxu1 %v4254_v50 }
  0x88   :  { %437 = vmatprep.mubr.bf16.mxu0 %v4823_v4  ;;  %510 = vmatprep.mubr.bf16.mxu1 %v4823_v4 }
  0x8a   :  { %773 = vmatpush1.bf16.msra.mxu0 %v4256_v51  ;;  %814 = vmatpush1.bf16.msra.mxu1 %v4258_v52 }
  0x8b   :  { %774 = vmatprep.subr.bf16.mxu0 %v4262_v53  ;;  %815 = vmatprep.subr.bf16.mxu1 %v4266_v54 }
  0x8d   :  { %438 = vmatmul.mubr.bf16.gmra.mxu0 %v3720_v55  ;;  %511 = vmatmul.mubr.bf16.gmra.mxu1 %v3720_v55 }
  0x8e   :  { %775 = vmatpush1.bf16.msra.mxu0 %v4270_v56  ;;  %816 = vmatpush1.bf16.msra.mxu1 %v4272_v57 }
  0x8f   :  { %776 = vmatprep.subr.bf16.mxu0 %v4274_v58  ;;  %817 = vmatprep.subr.bf16.mxu1 %v4276_v59 }
  0x90   :  { %447 = vmatprep.mubr.bf16.mxu0 %v4823_v4  ;;  %520 = vmatprep.mubr.bf16.mxu1 %v4823_v4 }
  0x92   :  { %777 = vmatpush1.bf16.msra.mxu0 %v4282_v60  ;;  %818 = vmatpush1.bf16.msra.mxu1 %v4284_v61 }
  0x93   :  { %778 = vmatprep.subr.bf16.mxu0 %v4286_v62  ;;  %819 = vmatprep.subr.bf16.mxu1 %v4288_v63 }
  0x95   :  { %448 = vmatmul.mubr.bf16.gmra.mxu0 %v3733_v0  ;;  %521 = vmatmul.mubr.bf16.gmra.mxu1 %v3733_v0 }
  0x96   :  { %779 = vmatpush1.bf16.msra.mxu0 %v4296_v1  ;;  %820 = vmatpush1.bf16.msra.mxu1 %v4298_v2 }
  0x97   :  { %780 = vmatprep.subr.bf16.mxu0 %v4300_v3  ;;  %821 = vmatprep.subr.bf16.mxu1 %v4302_v5 }
  0x98   :  { %798 = vmatprep.mubr.bf16.mxu0 %v4823_v4  ;;  %839 = vmatprep.mubr.bf16.mxu1 %v4823_v4 }
  0x9a   :  { %781 = vmatpush1.bf16.msra.mxu0 %v4310_v6  ;;  %822 = vmatpush1.bf16.msra.mxu1 %v4312_v7 }
  0x9b   :  { %1084 = vmatprep.subr.bf16.mxu0 %v4216_v35  ;;  %1125 = vmatprep.subr.bf16.mxu1 %v4218_v36 }
  0x9d   :  { %799 = vmatmul.mubr.bf16.vlgmr.msra.gmra.mxu0 %v573_v9  ;;  %840 = vmatmul.mubr.bf16.vlgmr.msra.gmra.mxu1 %v573_v9 }
  0x9e   :  { %1085 = vmatpush1.bf16.msra.mxu0 %v4220_v38  ;;  %1126 = vmatpush1.bf16.msra.mxu1 %v4222_v39 }
  0x9f   :  { %1086 = vmatprep.subr.bf16.mxu0 %v4226_v40  ;;  %1127 = vmatprep.subr.bf16.mxu1 %v4228_v41 }
  0xa0   :  { %1116 = vmatprep.mubr.bf16.mxu0 %v4823_v4  ;;  %1157 = vmatprep.mubr.bf16.mxu1 %v4823_v4 }
  0xa2   :  { %1087 = vmatpush1.bf16.msra.mxu0 %v4230_v42  ;;  %1128 = vmatpush1.bf16.msra.mxu1 %v4234_v43 }
  0xa3   :  { %1088 = vmatprep.subr.bf16.mxu0 %v4238_v44  ;;  %1129 = vmatprep.subr.bf16.mxu1 %v4240_v45 }
  0xa6   :  { %1089 = vmatpush1.bf16.msra.mxu0 %v4244_v47  ;;  %1130 = vmatpush1.bf16.msra.mxu1 %v4246_v48 }
  0xa7   :  { %1090 = vmatprep.subr.bf16.mxu0 %v4250_v49  ;;  %1131 = vmatprep.subr.bf16.mxu1 %v4254_v50 }
  0xaa   :  { %1091 = vmatpush1.bf16.msra.mxu0 %v4256_v51  ;;  %1132 = vmatpush1.bf16.msra.mxu1 %v4258_v52 }
  0xab   :  { %1092 = vmatprep.subr.bf16.mxu0 %v4262_v53  ;;  %1133 = vmatprep.subr.bf16.mxu1 %v4266_v54 }
  0xae   :  { %1093 = vmatpush1.bf16.msra.mxu0 %v4270_v56  ;;  %1134 = vmatpush1.bf16.msra.mxu1 %v4272_v57 }
  0xaf   :  { %1094 = vmatprep.subr.bf16.mxu0 %v4274_v58  ;;  %1135 = vmatprep.subr.bf16.mxu1 %v4276_v59 }
  0xb2   :  { %1095 = vmatpush1.bf16.msra.mxu0 %v4282_v60  ;;  %1136 = vmatpush1.bf16.msra.mxu1 %v4284_v61 }
  0xb3   :  { %1096 = vmatprep.subr.bf16.mxu0 %v4286_v62  ;;  %1137 = vmatprep.subr.bf16.mxu1 %v4288_v63 }
  0xb6   :  { %1097 = vmatpush1.bf16.msra.mxu0 %v4296_v1  ;;  %1138 = vmatpush1.bf16.msra.mxu1 %v4298_v2 }
  0xb7   :  { %1098 = vmatprep.subr.bf16.mxu0 %v4300_v3  ;;  %1139 = vmatprep.subr.bf16.mxu1 %v4302_v5 }
  0xba   :  { %1099 = vmatpush1.bf16.msra.mxu0 %v4310_v6  ;;  %1140 = vmatpush1.bf16.msra.mxu1 %v4312_v7 }
  0xbb   :  { %1403 = vmatprep.subr.bf16.mxu0 %v4216_v35  ;;  %1444 = vmatprep.subr.bf16.mxu1 %v4218_v36 }
 0x13d   :  { %v4360_v16 = vpop.f32.mrf.mxu0  ;;  %v4362_v17 = vpop.f32.mrf.mxu1 }
 0x13f   :  { %v4366_v20 = vpop.f32.mrf.mxu0  ;;  %v4368_v21 = vpop.f32.mrf.mxu1 }
 0x141   :  { %v423_v24 = vpop.f32.mrf.mxu0  ;;  %v496_v25 = vpop.f32.mrf.mxu1 }
 0x142   :  { %v4372_v27 = vadd.f32 %v423_v24, %v184_v22  ;;  %v4375_v28 = vadd.f32 %v496_v25, %v4364_v18 }
 0x143   :  { %v425_v29 = vpop.f32.mrf.mxu0  ;;  %v498_v30 = vpop.f32.mrf.mxu1 }
 0x144   :  { %v4377_v31 = vadd.f32 %v425_v29, %v188_v26  ;;  %v4380_v32 = vadd.f32 %v498_v30, %v4370_v23 }
 0x145   :  { %v429_v33 = vpop.f32.mrf.mxu0  ;;  %v502_v34 = vpop.f32.mrf.mxu1 }
 0x146   :  { %v4382_v37 = vadd.f32 %v429_v33, %v184_v22  ;;  %v4385_v46 = vadd.f32 %v502_v34, %v4364_v18 }
 0x147   :  { %v431_v55 = vpop.f32.mrf.mxu0  ;;  %v504_v0 = vpop.f32.mrf.mxu1 }
 0x148   :  { %4825 = vst [vmem:[#allocation25_spill] sm:$0xff] %v4385_v46  ;;  %v4387_v9 = vadd.f32 %v431_v55, %v188_v26  ;;  %v4390_v10 = vadd.f32 %v504_v0, %v4370_v23 }
 0x149   :  { %v433_v11 = vpop.f32.mrf.mxu0  ;;  %v506_v12 = vpop.f32.mrf.mxu1 }
 0x14a   :  { %4826 = vst [vmem:[#allocation26_spill] sm:$0xff] %v4390_v10  ;;  %v4392_v13 = vadd.f32 %v433_v11, %v184_v22  ;;  %v4395_v14 = vadd.f32 %v506_v12, %v4364_v18 }
 0x14b   :  { %v435_v15 = vpop.f32.mrf.mxu0  ;;  %v508_v19 = vpop.f32.mrf.mxu1 }
 0x14c   :  { %4827 = vst [vmem:[#allocation27_spill] sm:$0xff] %v4392_v13  ;;  %4828 = vst [vmem:[#allocation28_spill] sm:$0xff] %v4395_v14  ;;  %v4397_v24 = vadd.f32 %v435_v15, %v188_v26  ;;  %v4400_v25 = vadd.f32 %v508_v19, %v4370_v23 }
 0x14d   :  { %v439_v29 = vpop.f32.mrf.mxu0  ;;  %v512_v30 = vpop.f32.mrf.mxu1 }
 0x14e   :  { %4829 = vst [vmem:[#allocation29_spill] sm:$0xff] %v4397_v24  ;;  %4830 = vst [vmem:[#allocation30_spill] sm:$0xff] %v4400_v25  ;;  %v4402_v33 = vadd.f32 %v439_v29, %v184_v22  ;;  %v4405_v34 = vadd.f32 %v512_v30, %v4364_v18 }
 0x14f   :  { %v441_v55 = vpop.f32.mrf.mxu0  ;;  %v514_v0 = vpop.f32.mrf.mxu1 }
 0x150   :  { %4831 = vst [vmem:[#allocation31_spill] sm:$0xff] %v4402_v33  ;;  %4832 = vst [vmem:[#allocation32_spill] sm:$0xff] %v4405_v34  ;;  %v4407_v11 = vadd.f32 %v441_v55, %v188_v26  ;;  %v4410_v12 = vadd.f32 %v514_v0, %v4370_v23 }
 0x151   :  { %v443_v4 = vpop.f32.mrf.mxu0  ;;  %v516_v15 = vpop.f32.mrf.mxu1 }
 0x152   :  { %4833 = vst [vmem:[#allocation33_spill] sm:$0xff] %v4407_v11  ;;  %4834 = vst [vmem:[#allocation34_spill] sm:$0xff] %v4410_v12  ;;  %v4412_v14 = vadd.f32 %v443_v4, %v184_v22  ;;  %v4415_v19 = vadd.f32 %v516_v15, %v4364_v18 }
 0x153   :  { %v445_v25 = vpop.f32.mrf.mxu0  ;;  %v518_v29 = vpop.f32.mrf.mxu1 }
 0x154   :  { %4835 = vst [vmem:[#allocation35_spill] sm:$0xff] %v4412_v14  ;;  %4836 = vst [vmem:[#allocation36_spill] sm:$0xff] %v4415_v19  ;;  %v4417_v33 = vadd.f32 %v445_v25, %v188_v26  ;;  %v4420_v30 = vadd.f32 %v518_v29, %v4370_v23 }
 0x155   :  { %v449_v34 = vpop.f32.mrf.mxu0  ;;  %v522_v55 = vpop.f32.mrf.mxu1 }
 0x156   :  { %4837 = vst [vmem:[#allocation37_spill] sm:$0xff] %v4417_v33  ;;  %4838 = vst [vmem:[#allocation38_spill] sm:$0xff] %v4420_v30  ;;  %v4422_v11 = vadd.f32 %v449_v34, %v184_v22  ;;  %v4425_v0 = vadd.f32 %v522_v55, %v4364_v18 }
 0x157   :  { %v451_v12 = vpop.f32.mrf.mxu0  ;;  %v524_v4 = vpop.f32.mrf.mxu1 }
 0x158   :  { %4839 = vst [vmem:[#allocation39_spill] sm:$0xff] %v4422_v11  ;;  %4840 = vst [vmem:[#allocation40_spill] sm:$0xff] %v4425_v0  ;;  %v4427_v14 = vadd.f32 %v451_v12, %v188_v26  ;;  %v4430_v15 = vadd.f32 %v524_v4, %v4370_v23  ;;  %v420_v11 = vadd.f32 %v4360_v16, %v184_v22 }
 0x159   :  { %v453_v19 = vpop.f32.mrf.mxu0  ;;  %v526_v25 = vpop.f32.mrf.mxu1  ;;  %v422_v4 = vadd.f32 %v4366_v20, %v188_v26 }
 0x15a   :  { %4841 = vst [vmem:[#allocation41_spill] sm:$0xff] %v4427_v14  ;;  %4842 = vst [vmem:[#allocation42_spill] sm:$0xff] %v4430_v15  ;;  %v4432_v33 = vadd.f32 %v453_v19, %v184_v22  ;;  %v4435_v29 = vadd.f32 %v526_v25, %v4364_v18  ;;  %v495_v22 = vadd.f32 %v4368_v21, %v4370_v23 }
 0x15b   :  { %v455_v30 = vpop.f32.mrf.mxu0  ;;  %v528_v34 = vpop.f32.mrf.mxu1 }
 0x15c   :  { %4843 = vst [vmem:[#allocation43_spill] sm:$0xff] %v4432_v33  ;;  %4844 = vst [vmem:[#allocation44_spill] sm:$0xff] %v4435_v29  ;;  %v4438_v55 = vadd.f32 %v455_v30, %v188_v26  ;;  %v4441_v0 = vadd.f32 %v528_v34, %v4370_v23  ;;  %v493_v34 = vadd.f32 %v4362_v17, %v4364_v18 }
 0x15d   :  { %v800_v12 = vpop.f32.mrf.mxu0  ;;  %v841_v14 = vpop.f32.mrf.mxu1 }
 0x15e   :  { %v848_v15 = vadd.f32 %v800_v12, %v420_v11  ;;  %v850_v11 = vadd.f32 %v841_v14, %v493_v34  ;;  %v4845_v34 = vmov 0  }
 0x15f   :  { %v802_v24 = vpop.f32.mrf.mxu0  ;;  %v843_v19 = vpop.f32.mrf.mxu1 }
 0x160   :  { %v3337_v33 = vmul.f32 -1.442695, %v848_v15  ;;  %v849_v13 = vadd.f32 %v802_v24, %v422_v4  ;;  %v851_v30 = vadd.f32 %v843_v19, %v495_v22 }
 0x161   :  { %v804_v25 = vpop.f32.mrf.mxu0  ;;  %v845_v29 = vpop.f32.mrf.mxu1 }
 0x162   :  { %3794 = vpow2.f32 %v3337_v33  ;;  %v3338_v46 = vmul.f32 -1.442695, %v849_v13  ;;  %v3339_v20 = vmul.f32 -1.442695, %v851_v30  ;;  %v4448_v29 = vld [vmem:[#allocation7] sm:$0xff] }
 0x163   :  { %v805_v10 = vpop.f32.mrf.mxu0  ;;  %v846_v16 = vpop.f32.mrf.mxu1  ;;  %vm3340_vm0 = vcmp.gt.s32.totalorder %v4448_v29, 0  ;;  %vm3376_vm1 = vcmp.gt.s32.totalorder %v4448_v29, 1  ;;  %vm3412_vm2 = vcmp.gt.s32.totalorder %v4448_v29, 2  ;;  %vm3448_vm3 = vcmp.gt.s32.totalorder %v4448_v29, 3 }
 0x164   :  { %3796 = vpow2.f32 %v3338_v46  ;;  %v565_v46 = vld [vmem:[#allocation3] sm:$0xff]  ;;  %vm3484_vm4 = vcmp.gt.s32.totalorder %v4448_v29, 4  ;;  %vm3520_vm5 = vcmp.gt.s32.totalorder %v4448_v29, 5  ;;  %vm3556_vm6 = vcmp.gt.s32.totalorder %v4448_v29, 6 }
 0x165   :  { %3798 = vpow2.f32 %v3339_v20 }
 0x16f   :  { %v3795_v26 = vpop.eup %3794 }
 0x170   :  { %v855_v12 = vadd.f32 1.0, %v3795_v26 }
 0x171   :  { %v3797_v15 = vpop.eup %3796 }
 0x172   :  { %3800 = vrcp.f32 %v855_v12  ;;  %v861_v24 = vadd.f32 1.0, %v3797_v15  ;;  %v3799_v10 = vpop.eup %3798 }
 0x173   :  { %3802 = vtanh.f32 %v850_v11  ;;  %v868_v23 = vadd.f32 1.0, %v3799_v10 }
 0x174   :  { %3804 = vrcp.f32 %v861_v24 }
 0x175   :  { %3806 = vrcp.f32 %v868_v23 }
 0x17f   :  { %v3801_v13 = vpop.eup %3800 }
 0x180   :  { %v3803_v33 = vpop.eup %3802 }
 0x181   :  { %v3805_v21 = vpop.eup %3804  ;;  %v872_v4 = vmul.f32 %v3803_v33, %v3801_v13 }
 0x182   :  { %v871_v17 = vmul.f32 %v3805_v21, %v565_v46  ;;  %v3807_v19 = vpop.eup %3806 }
 0x184   :  { %v873_v18 = vadd.f32 %v872_v4, %v871_v17 }
 0x186   :  { %3808 = vtanh.f32 %v873_v18  ;;  %v4451_v14 = vsel %vm3340_vm0, %v873_v18, %v565_v46 }
 0x193   :  { %v3809_v25 = vpop.eup %3808 }
 0x194   :  { %v875_v16 = vmul.f32 %v3809_v25, %v3807_v19 }
 0x196   :  { %v4454_v22 = vsel %vm3340_vm0, %v875_v16, %v4314_v8 }
 0x197   :  { %v891_v30 = vpack.c.bf16 %v4454_v22, %v4454_v22 }
 0x199   :  { %1117 = vmatmul.mubr.bf16.vlgmr.msra.gmra.mxu0 %v891_v30  ;;  %1158 = vmatmul.mubr.bf16.vlgmr.msra.gmra.mxu1 %v891_v30 }
 0x19a   :  { %1404 = vmatpush1.bf16.msra.mxu0 %v4220_v38  ;;  %1445 = vmatpush1.bf16.msra.mxu1 %v4222_v39 }
 0x19b   :  { %1405 = vmatprep.subr.bf16.mxu0 %v4226_v40  ;;  %1446 = vmatprep.subr.bf16.mxu1 %v4228_v41 }
 0x19c   :  { %1435 = vmatprep.mubr.bf16.mxu0 %v4845_v34  ;;  %1476 = vmatprep.mubr.bf16.mxu1 %v4845_v34 }
 0x19e   :  { %1406 = vmatpush1.bf16.msra.mxu0 %v4230_v42  ;;  %1447 = vmatpush1.bf16.msra.mxu1 %v4234_v43 }
 0x19f   :  { %1407 = vmatprep.subr.bf16.mxu0 %v4238_v44  ;;  %1448 = vmatprep.subr.bf16.mxu1 %v4240_v45 }
 0x1a2   :  { %1408 = vmatpush1.bf16.msra.mxu0 %v4244_v47  ;;  %1449 = vmatpush1.bf16.msra.mxu1 %v4246_v48 }
 0x1a3   :  { %1409 = vmatprep.subr.bf16.mxu0 %v4250_v49  ;;  %1450 = vmatprep.subr.bf16.mxu1 %v4254_v50 }
 0x1a6   :  { %1410 = vmatpush1.bf16.msra.mxu0 %v4256_v51  ;;  %1451 = vmatpush1.bf16.msra.mxu1 %v4258_v52 }
 0x1a7   :  { %1411 = vmatprep.subr.bf16.mxu0 %v4262_v53  ;;  %1452 = vmatprep.subr.bf16.mxu1 %v4266_v54 }
 0x1aa   :  { %1412 = vmatpush1.bf16.msra.mxu0 %v4270_v56  ;;  %1453 = vmatpush1.bf16.msra.mxu1 %v4272_v57 }
 0x1ab   :  { %1413 = vmatprep.subr.bf16.mxu0 %v4274_v58  ;;  %1454 = vmatprep.subr.bf16.mxu1 %v4276_v59 }
 0x1ae   :  { %1414 = vmatpush1.bf16.msra.mxu0 %v4282_v60  ;;  %1455 = vmatpush1.bf16.msra.mxu1 %v4284_v61 }
 0x1af   :  { %1415 = vmatprep.subr.bf16.mxu0 %v4286_v62  ;;  %1456 = vmatprep.subr.bf16.mxu1 %v4288_v63 }
 0x1b2   :  { %1416 = vmatpush1.bf16.msra.mxu0 %v4296_v1  ;;  %1457 = vmatpush1.bf16.msra.mxu1 %v4298_v2 }
 0x1b3   :  { %1417 = vmatprep.subr.bf16.mxu0 %v4300_v3  ;;  %1458 = vmatprep.subr.bf16.mxu1 %v4302_v5 }
 0x1b6   :  { %1418 = vmatpush1.bf16.msra.mxu0 %v4310_v6  ;;  %1459 = vmatpush1.bf16.msra.mxu1 %v4312_v7 }
 0x1b7   :  { %1722 = vmatprep.subr.bf16.mxu0 %v4216_v35  ;;  %1763 = vmatprep.subr.bf16.mxu1 %v4218_v36 }
 0x259   :  { %v1118_v8 = vpop.f32.mrf.mxu0  ;;  %v1159_v20 = vpop.f32.mrf.mxu1 }
 0x25a   :  { %v1166_v26 = vadd.f32 %v1118_v8, %v4372_v27  ;;  %v1168_v36 = vadd.f32 %v1159_v20, %v4375_v28 }
 0x25b   :  { %v1120_v11 = vpop.f32.mrf.mxu0  ;;  %v1161_v12 = vpop.f32.mrf.mxu1 }
 0x25c   :  { %v3373_v15 = vmul.f32 -1.442695, %v1166_v26  ;;  %v1167_v24 = vadd.f32 %v1120_v11, %v4377_v31  ;;  %v1169_v35 = vadd.f32 %v1161_v12, %v4380_v32 }
 0x25d   :  { %v1122_v10 = vpop.f32.mrf.mxu0  ;;  %v1163_v13 = vpop.f32.mrf.mxu1 }
 0x25e   :  { %3810 = vpow2.f32 %v3373_v15  ;;  %v3374_v46 = vmul.f32 -1.442695, %v1167_v24  ;;  %v3375_v23 = vmul.f32 -1.442695, %v1169_v35  ;;  %v4554_v13 = vld [vmem:[#allocation13 + $0xe4] ss:$16 sps:$4 sm:$0xff]  }
 0x25f   :  { %v1123_v33 = vpop.f32.mrf.mxu0  ;;  %v1164_v21 = vpop.f32.mrf.mxu1  ;;  %v4566_v35 = vld [vmem:[#allocation13 + $0xc4] ss:$16 sps:$4 sm:$0xff]  }
 0x260   :  { %3812 = vpow2.f32 %v3374_v46  ;;  %v4556_v46 = vld [vmem:[#allocation13 + $0xec] ss:$16 sps:$4 sm:$0xff]   ;;  %v4558_v33 = vld [vmem:[#allocation13 + $0xe0] ss:$16 sps:$4 sm:$0xff]   ;;  %v4560_v21 = vld [vmem:[#allocation13 + $0xe8] ss:$16 sps:$4 sm:$0xff]  }
 0x261   :  { %3814 = vtanh.f32 %v1168_v36  ;;  %v4568_v36 = vld [vmem:[#allocation13 + $0xcc] ss:$16 sps:$4 sm:$0xff]  }
 0x262   :  { %3816 = vpow2.f32 %v3375_v23  ;;  %v4570_v23 = vld [vmem:[#allocation13 + $0xc0] ss:$16 sps:$4 sm:$0xff]  }
 0x26b   :  { %v3811_v4 = vpop.eup %3810 }
 0x26c   :  { %v1173_v17 = vadd.f32 1.0, %v3811_v4  ;;  %v4572_v4 = vld [vmem:[#allocation13 + $0xc8] ss:$16 sps:$4 sm:$0xff]  }
 0x26d   :  { %v3813_v27 = vpop.eup %3812 }
 0x26e   :  { %3818 = vrcp.f32 %v1173_v17  ;;  %v1179_v18 = vadd.f32 1.0, %v3813_v27  ;;  %v3815_v31 = vpop.eup %3814  ;;  %v4578_v17 = vld [vmem:[#allocation13 + $0xa4] ss:$16 sps:$4 sm:$0xff]   ;;  %v4580_v27 = vld [vmem:[#allocation13 + $0xac] ss:$16 sps:$4 sm:$0xff]  }
 0x26f   :  { %v3817_v19 = vpop.eup %3816 }
 0x270   :  { %3820 = vrcp.f32 %v1179_v18  ;;  %v1186_v8 = vadd.f32 1.0, %v3817_v19  ;;  %v4582_v18 = vld [vmem:[#allocation13 + $0xa0] ss:$16 sps:$4 sm:$0xff]   ;;  %v4590_v19 = vld [vmem:[#allocation13 + $0x84] ss:$16 sps:$4 sm:$0xff]  }
 0x272   :  { %3822 = vrcp.f32 %v1186_v8  ;;  %v4602_v8 = vld [vmem:[#allocation13 + $0x64] ss:$16 sps:$4 sm:$0xff]  }
 0x27b   :  { %v3819_v25 = vpop.eup %3818 }
 0x27c   :  { %v1190_v16 = vmul.f32 %v3819_v25, %v3815_v31  ;;  %v4584_v31 = vld [vmem:[#allocation13 + $0xa8] ss:$16 sps:$4 sm:$0xff]   ;;  %v4592_v25 = vld [vmem:[#allocation13 + $0x8c] ss:$16 sps:$4 sm:$0xff]  }
 0x27d   :  { %v3821_v30 = vpop.eup %3820 }
 0x27e   :  { %v1189_v26 = vmul.f32 %v3821_v30, %v4451_v14  ;;  %v4596_v30 = vld [vmem:[#allocation13 + $0x88] ss:$16 sps:$4 sm:$0xff]  }
 0x27f   :  { %v3823_v20 = vpop.eup %3822 }
 0x280   :  { %v1191_v28 = vadd.f32 %v1190_v16, %v1189_v26  ;;  %v4594_v16 = vld [vmem:[#allocation13 + $0x80] ss:$16 sps:$4 sm:$0xff]   ;;  %v4604_v26 = vld [vmem:[#allocation13 + $0x6c] ss:$16 sps:$4 sm:$0xff]  }
 0x282   :  { %3824 = vtanh.f32 %v1191_v28  ;;  %v4499_v32 = vsel %vm3376_vm1, %v1191_v28, %v4451_v14  ;;  %v4606_v28 = vld [vmem:[#allocation13 + $0x60] ss:$16 sps:$4 sm:$0xff]  }
 0x28f   :  { %v3825_v11 = vpop.eup %3824 }
 0x290   :  { %v1193_v12 = vmul.f32 %v3825_v11, %v3823_v20  ;;  %v4614_v20 = vld [vmem:[#allocation13 + $0x44] ss:$16 sps:$4 sm:$0xff]   ;;  %v4616_v11 = vld [vmem:[#allocation13 + $0x4c] ss:$16 sps:$4 sm:$0xff]  }
 0x292   :  { %v4502_v15 = vsel %vm3376_vm1, %v1193_v12, %v4454_v22  ;;  %v4618_v12 = vld [vmem:[#allocation13 + $0x40] ss:$16 sps:$4 sm:$0xff]  }
 0x293   :  { %v1210_v24 = vpack.c.bf16 %v4502_v15, %v4502_v15 }
 0x295   :  { %1436 = vmatmul.mubr.bf16.vlgmr.msra.gmra.mxu0 %v1210_v24  ;;  %1477 = vmatmul.mubr.bf16.vlgmr.msra.gmra.mxu1 %v1210_v24  ;;  %v4626_v24 = vld [vmem:[#allocation13 + $0x24] ss:$16 sps:$4 sm:$0xff]  }
 0x296   :  { %1723 = vmatpush1.bf16.msra.mxu0 %v4220_v38  ;;  %1764 = vmatpush1.bf16.msra.mxu1 %v4222_v39 }
 0x297   :  { %1724 = vmatprep.subr.bf16.mxu0 %v4226_v40  ;;  %1765 = vmatprep.subr.bf16.mxu1 %v4228_v41 }
 0x298   :  { %1754 = vmatprep.mubr.bf16.mxu0 %v4845_v34  ;;  %1795 = vmatprep.mubr.bf16.mxu1 %v4845_v34 }
 0x29a   :  { %1725 = vmatpush1.bf16.msra.mxu0 %v4230_v42  ;;  %1766 = vmatpush1.bf16.msra.mxu1 %v4234_v43 }
 0x29b   :  { %1726 = vmatprep.subr.bf16.mxu0 %v4238_v44  ;;  %1767 = vmatprep.subr.bf16.mxu1 %v4240_v45 }
 0x29e   :  { %1727 = vmatpush1.bf16.msra.mxu0 %v4244_v47  ;;  %1768 = vmatpush1.bf16.msra.mxu1 %v4246_v48 }
 0x29f   :  { %1728 = vmatprep.subr.bf16.mxu0 %v4250_v49  ;;  %1769 = vmatprep.subr.bf16.mxu1 %v4254_v50 }
 0x2a2   :  { %1729 = vmatpush1.bf16.msra.mxu0 %v4256_v51  ;;  %1770 = vmatpush1.bf16.msra.mxu1 %v4258_v52  ;;  %v4846_v51 = vld [vmem:[#allocation26_spill] sm:$0xff] }
 0x2a3   :  { %1730 = vmatprep.subr.bf16.mxu0 %v4262_v53  ;;  %1771 = vmatprep.subr.bf16.mxu1 %v4266_v54  ;;  %v4847_v53 = vld [vmem:[#allocation25_spill] sm:$0xff] }
 0x2a6   :  { %1731 = vmatpush1.bf16.msra.mxu0 %v4270_v56  ;;  %1772 = vmatpush1.bf16.msra.mxu1 %v4272_v57 }
 0x2a7   :  { %1732 = vmatprep.subr.bf16.mxu0 %v4274_v58  ;;  %1773 = vmatprep.subr.bf16.mxu1 %v4276_v59 }
 0x2aa   :  { %1733 = vmatpush1.bf16.msra.mxu0 %v4282_v60  ;;  %1774 = vmatpush1.bf16.msra.mxu1 %v4284_v61 }
 0x2ab   :  { %1734 = vmatprep.subr.bf16.mxu0 %v4286_v62  ;;  %1775 = vmatprep.subr.bf16.mxu1 %v4288_v63 }
 0x2ae   :  { %1735 = vmatpush1.bf16.msra.mxu0 %v4296_v1  ;;  %1776 = vmatpush1.bf16.msra.mxu1 %v4298_v2 }
 0x2af   :  { %1736 = vmatprep.subr.bf16.mxu0 %v4300_v3  ;;  %1777 = vmatprep.subr.bf16.mxu1 %v4302_v5 }
 0x2b2   :  { %1737 = vmatpush1.bf16.msra.mxu0 %v4310_v6  ;;  %1778 = vmatpush1.bf16.msra.mxu1 %v4312_v7 }
 0x2b3   :  { %2041 = vmatprep.subr.bf16.mxu0 %v4554_v13  ;;  %2082 = vmatprep.subr.bf16.mxu1 %v4556_v46 }
 0x355   :  { %v1437_v38 = vpop.f32.mrf.mxu0  ;;  %v1478_v39 = vpop.f32.mrf.mxu1 }
 0x356   :  { %v1485_v40 = vadd.f32 %v1437_v38, %v4382_v37  ;;  %v1487_v54 = vadd.f32 %v1478_v39, %v4847_v53  ;;  %v4628_v38 = vld [vmem:[#allocation13 + $0x2c] ss:$16 sps:$4 sm:$0xff]   ;;  %v4630_v39 = vld [vmem:[#allocation13 + $0x20] ss:$16 sps:$4 sm:$0xff]   ;;  %v4849_v53 = vld [vmem:[#allocation29_spill] sm:$0xff] }
 0x357   :  { %v1439_v41 = vpop.f32.mrf.mxu0  ;;  %v1480_v42 = vpop.f32.mrf.mxu1 }
 0x358   :  { %v3409_v43 = vmul.f32 -1.442695, %v1485_v40  ;;  %v1486_v44 = vadd.f32 %v1439_v41, %v4387_v9  ;;  %v1488_v52 = vadd.f32 %v1480_v42, %v4846_v51  ;;  %v4632_v40 = vld [vmem:[#allocation13 + $0x28] ss:$16 sps:$4 sm:$0xff]   ;;  %v4638_v41 = vld [vmem:[#allocation13 + $0x4] ss:$16 sps:$4 sm:$0xff]  }
 0x359   :  { %v1441_v45 = vpop.f32.mrf.mxu0  ;;  %v1482_v47 = vpop.f32.mrf.mxu1  ;;  %v4640_v42 = vld [vmem:[#allocation13 + $0xc] ss:$16 sps:$4 sm:$0xff]  }
 0x35a   :  { %3826 = vpow2.f32 %v3409_v43  ;;  %v3410_v48 = vmul.f32 -1.442695, %v1486_v44  ;;  %v3411_v56 = vmul.f32 -1.442695, %v1488_v52  ;;  %v4642_v43 = vld [vmem:[#allocation13] ss:$16 sps:$4 sm:$0xff]  }
 0x35b   :  { %v1442_v49 = vpop.f32.mrf.mxu0  ;;  %v1483_v50 = vpop.f32.mrf.mxu1  ;;  %v4644_v44 = vld [vmem:[#allocation13 + $0x8] ss:$16 sps:$4 sm:$0xff]  }
 0x35c   :  { %3828 = vpow2.f32 %v3410_v48  ;;  %v4848_v48 = vld [vmem:[#allocation27_spill] sm:$0xff] }
 0x35d   :  { %3830 = vtanh.f32 %v1487_v54 }
 0x35e   :  { %3832 = vpow2.f32 %v3411_v56 }
 0x367   :  { %v3827_v57 = vpop.eup %3826 }
 0x368   :  { %v1492_v58 = vadd.f32 1.0, %v3827_v57 }
 0x369   :  { %v3829_v59 = vpop.eup %3828 }
 0x36a   :  { %3834 = vrcp.f32 %v1492_v58  ;;  %v1498_v60 = vadd.f32 1.0, %v3829_v59  ;;  %v3831_v61 = vpop.eup %3830 }
 0x36b   :  { %v3833_v62 = vpop.eup %3832 }
 0x36c   :  { %3836 = vrcp.f32 %v1498_v60  ;;  %v1505_v3 = vadd.f32 1.0, %v3833_v62 }
 0x36e   :  { %3838 = vrcp.f32 %v1505_v3 }
 0x377   :  { %v3835_v63 = vpop.eup %3834 }
 0x378   :  { %v1509_v1 = vmul.f32 %v3835_v63, %v3831_v61  ;;  %v4850_v61 = vld [vmem:[#allocation30_spill] sm:$0xff]  ;;  %v4851_v63 = vld [vmem:[#allocation28_spill] sm:$0xff] }
 0x379   :  { %v3837_v2 = vpop.eup %3836 }
 0x37a   :  { %v1508_v5 = vmul.f32 %v3837_v2, %v4499_v32 }
 0x37b   :  { %v3839_v37 = vpop.eup %3838 }
 0x37c   :  { %v1510_v6 = vadd.f32 %v1509_v1, %v1508_v5 }
 0x37e   :  { %3840 = vtanh.f32 %v1510_v6  ;;  %v4545_v7 = vsel %vm3412_vm2, %v1510_v6, %v4499_v32  ;;  %v4608_v32 = vld [vmem:[#allocation13 + $0x68] ss:$16 sps:$4 sm:$0xff]  }
 0x38b   :  { %v3841_v9 = vpop.eup %3840 }
 0x38c   :  { %v1512_v14 = vmul.f32 %v3841_v9, %v3839_v37 }
 0x38e   :  { %v4548_v22 = vsel %vm3412_vm2, %v1512_v14, %v4502_v15  ;;  %v4620_v15 = vld [vmem:[#allocation13 + $0x48] ss:$16 sps:$4 sm:$0xff]  }
 0x38f   :  { %v1529_v10 = vpack.c.bf16 %v4548_v22, %v4548_v22 }
 0x391   :  { %1755 = vmatmul.mubr.bf16.vlgmr.msra.gmra.mxu0 %v1529_v10  ;;  %1796 = vmatmul.mubr.bf16.vlgmr.msra.gmra.mxu1 %v1529_v10 }
 0x392   :  { %2073 = vmatprep.mubr.bf16.mxu0 %v4845_v34  ;;  %2114 = vmatprep.mubr.bf16.mxu1 %v4845_v34 }
 0x393   :  { %2042 = vmatpush1.bf16.msra.mxu0 %v4558_v33  ;;  %2083 = vmatpush1.bf16.msra.mxu1 %v4560_v21 }
 0x394   :  { %2043 = vmatprep.subr.bf16.mxu0 %v4566_v35  ;;  %2084 = vmatprep.subr.bf16.mxu1 %v4568_v36 }
 0x397   :  { %2044 = vmatpush1.bf16.msra.mxu0 %v4570_v23  ;;  %2085 = vmatpush1.bf16.msra.mxu1 %v4572_v4 }
 0x398   :  { %2045 = vmatprep.subr.bf16.mxu0 %v4578_v17  ;;  %2086 = vmatprep.subr.bf16.mxu1 %v4580_v27 }
 0x39b   :  { %2046 = vmatpush1.bf16.msra.mxu0 %v4582_v18  ;;  %2087 = vmatpush1.bf16.msra.mxu1 %v4584_v31 }
 0x39c   :  { %2047 = vmatprep.subr.bf16.mxu0 %v4590_v19  ;;  %2088 = vmatprep.subr.bf16.mxu1 %v4592_v25 }
 0x39f   :  { %2048 = vmatpush1.bf16.msra.mxu0 %v4594_v16  ;;  %2089 = vmatpush1.bf16.msra.mxu1 %v4596_v30 }
 0x3a0   :  { %2049 = vmatprep.subr.bf16.mxu0 %v4602_v8  ;;  %2090 = vmatprep.subr.bf16.mxu1 %v4604_v26 }
 0x3a3   :  { %2050 = vmatpush1.bf16.msra.mxu0 %v4606_v28  ;;  %2091 = vmatpush1.bf16.msra.mxu1 %v4608_v32 }
 0x3a4   :  { %2051 = vmatprep.subr.bf16.mxu0 %v4614_v20  ;;  %2092 = vmatprep.subr.bf16.mxu1 %v4616_v11 }
 0x3a7   :  { %2052 = vmatpush1.bf16.msra.mxu0 %v4618_v12  ;;  %2093 = vmatpush1.bf16.msra.mxu1 %v4620_v15 }
 0x3a8   :  { %2053 = vmatprep.subr.bf16.mxu0 %v4626_v24  ;;  %2094 = vmatprep.subr.bf16.mxu1 %v4628_v38 }
 0x3ab   :  { %2054 = vmatpush1.bf16.msra.mxu0 %v4630_v39  ;;  %2095 = vmatpush1.bf16.msra.mxu1 %v4632_v40 }
 0x3ac   :  { %2055 = vmatprep.subr.bf16.mxu0 %v4638_v41  ;;  %2096 = vmatprep.subr.bf16.mxu1 %v4640_v42 }
 0x3af   :  { %2056 = vmatpush1.bf16.msra.mxu0 %v4642_v43  ;;  %2097 = vmatpush1.bf16.msra.mxu1 %v4644_v44 }
 0x3b0   :  { %2360 = vmatprep.subr.bf16.mxu0 %v4554_v13  ;;  %2401 = vmatprep.subr.bf16.mxu1 %v4556_v46 }
 0x451   :  { %v1756_v45 = vpop.f32.mrf.mxu0  ;;  %v1797_v47 = vpop.f32.mrf.mxu1 }
 0x452   :  { %v1804_v49 = vadd.f32 %v1756_v45, %v4848_v48  ;;  %v1806_v1 = vadd.f32 %v1797_v47, %v4851_v63  ;;  %v4853_v63 = vld [vmem:[#allocation33_spill] sm:$0xff] }
 0x453   :  { %v1758_v50 = vpop.f32.mrf.mxu0  ;;  %v1799_v51 = vpop.f32.mrf.mxu1 }
 0x454   :  { %v3445_v52 = vmul.f32 -1.442695, %v1804_v49  ;;  %v1805_v54 = vadd.f32 %v1758_v50, %v4849_v53  ;;  %v1807_v62 = vadd.f32 %v1799_v51, %v4850_v61 }
 0x455   :  { %v1760_v56 = vpop.f32.mrf.mxu0  ;;  %v1801_v57 = vpop.f32.mrf.mxu1 }
 0x456   :  { %3842 = vpow2.f32 %v3445_v52  ;;  %v3446_v58 = vmul.f32 -1.442695, %v1805_v54  ;;  %v3447_v2 = vmul.f32 -1.442695, %v1807_v62 }
 0x457   :  { %v1761_v59 = vpop.f32.mrf.mxu0  ;;  %v1802_v60 = vpop.f32.mrf.mxu1 }
 0x458   :  { %3844 = vpow2.f32 %v3446_v58  ;;  %v4852_v58 = vld [vmem:[#allocation31_spill] sm:$0xff] }
 0x459   :  { %3846 = vtanh.f32 %v1806_v1 }
 0x45a   :  { %3848 = vpow2.f32 %v3447_v2 }
 0x463   :  { %v3843_v3 = vpop.eup %3842 }
 0x464   :  { %v1811_v5 = vadd.f32 1.0, %v3843_v3 }
 0x465   :  { %v3845_v6 = vpop.eup %3844 }
 0x466   :  { %3850 = vrcp.f32 %v1811_v5  ;;  %v1817_v37 = vadd.f32 1.0, %v3845_v6  ;;  %v3847_v9 = vpop.eup %3846 }
 0x467   :  { %v3849_v14 = vpop.eup %3848 }
 0x468   :  { %3852 = vrcp.f32 %v1817_v37  ;;  %v1824_v49 = vadd.f32 1.0, %v3849_v14 }
 0x46a   :  { %3854 = vrcp.f32 %v1824_v49 }
 0x473   :  { %v3851_v10 = vpop.eup %3850 }
 0x474   :  { %v1828_v45 = vmul.f32 %v3851_v10, %v3847_v9  ;;  %v4854_v9 = vld [vmem:[#allocation34_spill] sm:$0xff]  ;;  %v4855_v10 = vld [vmem:[#allocation32_spill] sm:$0xff] }
 0x475   :  { %v3853_v48 = vpop.eup %3852 }
 0x476   :  { %v1827_v50 = vmul.f32 %v3853_v48, %v4545_v7 }
 0x477   :  { %v3855_v52 = vpop.eup %3854 }
 0x478   :  { %v1829_v47 = vadd.f32 %v1828_v45, %v1827_v50 }
 0x47a   :  { %3856 = vtanh.f32 %v1829_v47  ;;  %v4659_v51 = vsel %vm3448_vm3, %v1829_v47, %v4545_v7 }
 0x487   :  { %v3857_v53 = vpop.eup %3856 }
 0x488   :  { %v1831_v54 = vmul.f32 %v3857_v53, %v3855_v52 }
 0x48a   :  { %v4662_v56 = vsel %vm3448_vm3, %v1831_v54, %v4548_v22 }
 0x48b   :  { %v1848_v57 = vpack.c.bf16 %v4662_v56, %v4662_v56 }
 0x48d   :  { %2074 = vmatmul.mubr.bf16.vlgmr.msra.gmra.mxu0 %v1848_v57  ;;  %2115 = vmatmul.mubr.bf16.vlgmr.msra.gmra.mxu1 %v1848_v57 }
 0x48e   :  { %2361 = vmatpush1.bf16.msra.mxu0 %v4558_v33  ;;  %2402 = vmatpush1.bf16.msra.mxu1 %v4560_v21 }
 0x48f   :  { %2362 = vmatprep.subr.bf16.mxu0 %v4566_v35  ;;  %2403 = vmatprep.subr.bf16.mxu1 %v4568_v36 }
 0x490   :  { %2392 = vmatprep.mubr.bf16.mxu0 %v4845_v34  ;;  %2433 = vmatprep.mubr.bf16.mxu1 %v4845_v34 }
 0x492   :  { %2363 = vmatpush1.bf16.msra.mxu0 %v4570_v23  ;;  %2404 = vmatpush1.bf16.msra.mxu1 %v4572_v4 }
 0x493   :  { %2364 = vmatprep.subr.bf16.mxu0 %v4578_v17  ;;  %2405 = vmatprep.subr.bf16.mxu1 %v4580_v27 }
 0x496   :  { %2365 = vmatpush1.bf16.msra.mxu0 %v4582_v18  ;;  %2406 = vmatpush1.bf16.msra.mxu1 %v4584_v31 }
 0x497   :  { %2366 = vmatprep.subr.bf16.mxu0 %v4590_v19  ;;  %2407 = vmatprep.subr.bf16.mxu1 %v4592_v25 }
 0x49a   :  { %2367 = vmatpush1.bf16.msra.mxu0 %v4594_v16  ;;  %2408 = vmatpush1.bf16.msra.mxu1 %v4596_v30 }
 0x49b   :  { %2368 = vmatprep.subr.bf16.mxu0 %v4602_v8  ;;  %2409 = vmatprep.subr.bf16.mxu1 %v4604_v26 }
 0x49e   :  { %2369 = vmatpush1.bf16.msra.mxu0 %v4606_v28  ;;  %2410 = vmatpush1.bf16.msra.mxu1 %v4608_v32 }
 0x49f   :  { %2370 = vmatprep.subr.bf16.mxu0 %v4614_v20  ;;  %2411 = vmatprep.subr.bf16.mxu1 %v4616_v11 }
 0x4a2   :  { %2371 = vmatpush1.bf16.msra.mxu0 %v4618_v12  ;;  %2412 = vmatpush1.bf16.msra.mxu1 %v4620_v15 }
 0x4a3   :  { %2372 = vmatprep.subr.bf16.mxu0 %v4626_v24  ;;  %2413 = vmatprep.subr.bf16.mxu1 %v4628_v38 }
 0x4a6   :  { %2373 = vmatpush1.bf16.msra.mxu0 %v4630_v39  ;;  %2414 = vmatpush1.bf16.msra.mxu1 %v4632_v40 }
 0x4a7   :  { %2374 = vmatprep.subr.bf16.mxu0 %v4638_v41  ;;  %2415 = vmatprep.subr.bf16.mxu1 %v4640_v42 }
 0x4aa   :  { %2375 = vmatpush1.bf16.msra.mxu0 %v4642_v43  ;;  %2416 = vmatpush1.bf16.msra.mxu1 %v4644_v44 }
 0x4ab   :  { %2679 = vmatprep.subr.bf16.mxu0 %v4554_v13  ;;  %2720 = vmatprep.subr.bf16.mxu1 %v4556_v46 }
 0x54d   :  { %v2075_v7 = vpop.f32.mrf.mxu0  ;;  %v2116_v22 = vpop.f32.mrf.mxu1 }
 0x54e   :  { %v2123_v59 = vadd.f32 %v2075_v7, %v4852_v58  ;;  %v2125_v45 = vadd.f32 %v2116_v22, %v4855_v10  ;;  %v4857_v10 = vld [vmem:[#allocation37_spill] sm:$0xff] }
 0x54f   :  { %v2077_v60 = vpop.f32.mrf.mxu0  ;;  %v2118_v61 = vpop.f32.mrf.mxu1 }
 0x550   :  { %v3481_v62 = vmul.f32 -1.442695, %v2123_v59  ;;  %v2124_v1 = vadd.f32 %v2077_v60, %v4853_v63  ;;  %v2126_v14 = vadd.f32 %v2118_v61, %v4854_v9 }
 0x551   :  { %v2079_v2 = vpop.f32.mrf.mxu0  ;;  %v2120_v3 = vpop.f32.mrf.mxu1 }
 0x552   :  { %3858 = vpow2.f32 %v3481_v62  ;;  %v3482_v5 = vmul.f32 -1.442695, %v2124_v1  ;;  %v3483_v48 = vmul.f32 -1.442695, %v2126_v14 }
 0x553   :  { %v2080_v6 = vpop.f32.mrf.mxu0  ;;  %v2121_v37 = vpop.f32.mrf.mxu1 }
 0x554   :  { %3860 = vpow2.f32 %v3482_v5  ;;  %v4856_v5 = vld [vmem:[#allocation35_spill] sm:$0xff] }
 0x555   :  { %3862 = vtanh.f32 %v2125_v45 }
 0x556   :  { %3864 = vpow2.f32 %v3483_v48 }
 0x55f   :  { %v3859_v49 = vpop.eup %3858 }
 0x560   :  { %v2130_v50 = vadd.f32 1.0, %v3859_v49 }
 0x561   :  { %v3861_v47 = vpop.eup %3860 }
 0x562   :  { %3866 = vrcp.f32 %v2130_v50  ;;  %v2136_v52 = vadd.f32 1.0, %v3861_v47  ;;  %v3863_v53 = vpop.eup %3862 }
 0x563   :  { %v3865_v54 = vpop.eup %3864 }
 0x564   :  { %3868 = vrcp.f32 %v2136_v52  ;;  %v2143_v59 = vadd.f32 1.0, %v3865_v54  ;;  %v4859_v54 = vld [vmem:[#allocation36_spill] sm:$0xff] }
 0x566   :  { %3870 = vrcp.f32 %v2143_v59 }
 0x56f   :  { %v3867_v57 = vpop.eup %3866 }
 0x570   :  { %v2147_v7 = vmul.f32 %v3867_v57, %v3863_v53  ;;  %v4858_v53 = vld [vmem:[#allocation38_spill] sm:$0xff] }
 0x571   :  { %v3869_v58 = vpop.eup %3868 }
 0x572   :  { %v2146_v60 = vmul.f32 %v3869_v58, %v4659_v51 }
 0x573   :  { %v3871_v62 = vpop.eup %3870 }
 0x574   :  { %v2148_v22 = vadd.f32 %v2147_v7, %v2146_v60 }
 0x576   :  { %3872 = vtanh.f32 %v2148_v22  ;;  %v4707_v61 = vsel %vm3484_vm4, %v2148_v22, %v4659_v51 }
 0x583   :  { %v3873_v63 = vpop.eup %3872 }
 0x584   :  { %v2150_v1 = vmul.f32 %v3873_v63, %v3871_v62 }
 0x586   :  { %v4710_v2 = vsel %vm3484_vm4, %v2150_v1, %v4662_v56 }
 0x587   :  { %v2167_v3 = vpack.c.bf16 %v4710_v2, %v4710_v2 }
 0x589   :  { %2393 = vmatmul.mubr.bf16.vlgmr.msra.gmra.mxu0 %v2167_v3  ;;  %2434 = vmatmul.mubr.bf16.vlgmr.msra.gmra.mxu1 %v2167_v3 }
 0x58a   :  { %2680 = vmatpush1.bf16.msra.mxu0 %v4558_v33  ;;  %2721 = vmatpush1.bf16.msra.mxu1 %v4560_v21 }
 0x58b   :  { %2681 = vmatprep.subr.bf16.mxu0 %v4566_v35  ;;  %2722 = vmatprep.subr.bf16.mxu1 %v4568_v36 }
 0x58c   :  { %2711 = vmatprep.mubr.bf16.mxu0 %v4845_v34  ;;  %2752 = vmatprep.mubr.bf16.mxu1 %v4845_v34 }
 0x58e   :  { %2682 = vmatpush1.bf16.msra.mxu0 %v4570_v23  ;;  %2723 = vmatpush1.bf16.msra.mxu1 %v4572_v4 }
 0x58f   :  { %2683 = vmatprep.subr.bf16.mxu0 %v4578_v17  ;;  %2724 = vmatprep.subr.bf16.mxu1 %v4580_v27 }
 0x592   :  { %2684 = vmatpush1.bf16.msra.mxu0 %v4582_v18  ;;  %2725 = vmatpush1.bf16.msra.mxu1 %v4584_v31 }
 0x593   :  { %2685 = vmatprep.subr.bf16.mxu0 %v4590_v19  ;;  %2726 = vmatprep.subr.bf16.mxu1 %v4592_v25 }
 0x596   :  { %2686 = vmatpush1.bf16.msra.mxu0 %v4594_v16  ;;  %2727 = vmatpush1.bf16.msra.mxu1 %v4596_v30 }
 0x597   :  { %2687 = vmatprep.subr.bf16.mxu0 %v4602_v8  ;;  %2728 = vmatprep.subr.bf16.mxu1 %v4604_v26 }
 0x59a   :  { %2688 = vmatpush1.bf16.msra.mxu0 %v4606_v28  ;;  %2729 = vmatpush1.bf16.msra.mxu1 %v4608_v32 }
 0x59b   :  { %2689 = vmatprep.subr.bf16.mxu0 %v4614_v20  ;;  %2730 = vmatprep.subr.bf16.mxu1 %v4616_v11 }
 0x59e   :  { %2690 = vmatpush1.bf16.msra.mxu0 %v4618_v12  ;;  %2731 = vmatpush1.bf16.msra.mxu1 %v4620_v15 }
 0x59f   :  { %2691 = vmatprep.subr.bf16.mxu0 %v4626_v24  ;;  %2732 = vmatprep.subr.bf16.mxu1 %v4628_v38 }
 0x5a2   :  { %2692 = vmatpush1.bf16.msra.mxu0 %v4630_v39  ;;  %2733 = vmatpush1.bf16.msra.mxu1 %v4632_v40 }
 0x5a3   :  { %2693 = vmatprep.subr.bf16.mxu0 %v4638_v41  ;;  %2734 = vmatprep.subr.bf16.mxu1 %v4640_v42 }
 0x5a6   :  { %2694 = vmatpush1.bf16.msra.mxu0 %v4642_v43  ;;  %2735 = vmatpush1.bf16.msra.mxu1 %v4644_v44 }
 0x5a7   :  { %2998 = vmatprep.subr.bf16.mxu0 %v4554_v13  ;;  %3039 = vmatprep.subr.bf16.mxu1 %v4556_v46 }
 0x649   :  { %v2394_v51 = vpop.f32.mrf.mxu0  ;;  %v2435_v56 = vpop.f32.mrf.mxu1 }
 0x64a   :  { %v2442_v6 = vadd.f32 %v2394_v51, %v4856_v5  ;;  %v2444_v46 = vadd.f32 %v2435_v56, %v4859_v54 }
 0x64b   :  { %v2396_v37 = vpop.f32.mrf.mxu0  ;;  %v2437_v9 = vpop.f32.mrf.mxu1 }
 0x64c   :  { %v3517_v14 = vmul.f32 -1.442695, %v2442_v6  ;;  %v2443_v45 = vadd.f32 %v2396_v37, %v4857_v10  ;;  %v2445_v13 = vadd.f32 %v2437_v9, %v4858_v53 }
 0x64d   :  { %v2398_v48 = vpop.f32.mrf.mxu0  ;;  %v2439_v49 = vpop.f32.mrf.mxu1 }
 0x64e   :  { %3874 = vpow2.f32 %v3517_v14  ;;  %v3518_v50 = vmul.f32 -1.442695, %v2443_v45  ;;  %v3519_v57 = vmul.f32 -1.442695, %v2445_v13  ;;  %v4864_v13 = vld [vmem:[#allocation43_spill] sm:$0xff] }
 0x64f   :  { %v2399_v47 = vpop.f32.mrf.mxu0  ;;  %v2440_v52 = vpop.f32.mrf.mxu1 }
 0x650   :  { %3876 = vpow2.f32 %v3518_v50 }
 0x651   :  { %3878 = vtanh.f32 %v2444_v46 }
 0x652   :  { %3880 = vpow2.f32 %v3519_v57 }
 0x65b   :  { %v3875_v7 = vpop.eup %3874 }
 0x65c   :  { %v2449_v58 = vadd.f32 1.0, %v3875_v7 }
 0x65d   :  { %v3877_v59 = vpop.eup %3876 }
 0x65e   :  { %3882 = vrcp.f32 %v2449_v58  ;;  %v2455_v60 = vadd.f32 1.0, %v3877_v59  ;;  %v3879_v22 = vpop.eup %3878 }
 0x65f   :  { %v3881_v62 = vpop.eup %3880 }
 0x660   :  { %3884 = vrcp.f32 %v2455_v60  ;;  %v2462_v51 = vadd.f32 1.0, %v3881_v62 }
 0x662   :  { %3886 = vrcp.f32 %v2462_v51 }
 0x66b   :  { %v3883_v63 = vpop.eup %3882 }
 0x66c   :  { %v2466_v1 = vmul.f32 %v3883_v63, %v3879_v22 }
 0x66d   :  { %v3885_v3 = vpop.eup %3884 }
 0x66e   :  { %v2465_v5 = vmul.f32 %v3885_v3, %v4707_v61 }
 0x66f   :  { %v3887_v37 = vpop.eup %3886 }
 0x670   :  { %v2467_v56 = vadd.f32 %v2466_v1, %v2465_v5  ;;  %v4865_v1 = vld [vmem:[#allocation44_spill] sm:$0xff] }
 0x672   :  { %3888 = vtanh.f32 %v2467_v56  ;;  %v4755_v6 = vsel %vm3520_vm5, %v2467_v56, %v4707_v61 }
 0x67f   :  { %v3889_v9 = vpop.eup %3888 }
 0x680   :  { %v2469_v14 = vmul.f32 %v3889_v9, %v3887_v37 }
 0x682   :  { %v4758_v10 = vsel %vm3520_vm5, %v2469_v14, %v4710_v2 }
 0x683   :  { %v2486_v45 = vpack.c.bf16 %v4758_v10, %v4758_v10 }
 0x685   :  { %2712 = vmatmul.mubr.bf16.vlgmr.msra.gmra.mxu0 %v2486_v45  ;;  %2753 = vmatmul.mubr.bf16.vlgmr.msra.gmra.mxu1 %v2486_v45 }
 0x686   :  { %2999 = vmatpush1.bf16.msra.mxu0 %v4558_v33  ;;  %3040 = vmatpush1.bf16.msra.mxu1 %v4560_v21  ;;  %v4860_v21 = vld [vmem:[#allocation39_spill] sm:$0xff] }
 0x687   :  { %3000 = vmatprep.subr.bf16.mxu0 %v4566_v35  ;;  %3041 = vmatprep.subr.bf16.mxu1 %v4568_v36 }
 0x688   :  { %3030 = vmatprep.mubr.bf16.mxu0 %v4845_v34  ;;  %3071 = vmatprep.mubr.bf16.mxu1 %v4845_v34 }
 0x68a   :  { %3001 = vmatpush1.bf16.msra.mxu0 %v4570_v23  ;;  %3042 = vmatpush1.bf16.msra.mxu1 %v4572_v4 }
 0x68b   :  { %3002 = vmatprep.subr.bf16.mxu0 %v4578_v17  ;;  %3043 = vmatprep.subr.bf16.mxu1 %v4580_v27  ;;  %v4861_v17 = vld [vmem:[#allocation41_spill] sm:$0xff] }
 0x68e   :  { %3003 = vmatpush1.bf16.msra.mxu0 %v4582_v18  ;;  %3044 = vmatpush1.bf16.msra.mxu1 %v4584_v31 }
 0x68f   :  { %3004 = vmatprep.subr.bf16.mxu0 %v4590_v19  ;;  %3045 = vmatprep.subr.bf16.mxu1 %v4592_v25 }
 0x692   :  { %3005 = vmatpush1.bf16.msra.mxu0 %v4594_v16  ;;  %3046 = vmatpush1.bf16.msra.mxu1 %v4596_v30  ;;  %v4862_v30 = vld [vmem:[#allocation42_spill] sm:$0xff] }
 0x693   :  { %3006 = vmatprep.subr.bf16.mxu0 %v4602_v8  ;;  %3047 = vmatprep.subr.bf16.mxu1 %v4604_v26  ;;  %v4863_v26 = vld [vmem:[#allocation40_spill] sm:$0xff] }
 0x696   :  { %3007 = vmatpush1.bf16.msra.mxu0 %v4606_v28  ;;  %3048 = vmatpush1.bf16.msra.mxu1 %v4608_v32 }
 0x697   :  { %3008 = vmatprep.subr.bf16.mxu0 %v4614_v20  ;;  %3049 = vmatprep.subr.bf16.mxu1 %v4616_v11 }
 0x69a   :  { %3009 = vmatpush1.bf16.msra.mxu0 %v4618_v12  ;;  %3050 = vmatpush1.bf16.msra.mxu1 %v4620_v15 }
 0x69b   :  { %3010 = vmatprep.subr.bf16.mxu0 %v4626_v24  ;;  %3051 = vmatprep.subr.bf16.mxu1 %v4628_v38 }
 0x69e   :  { %3011 = vmatpush1.bf16.msra.mxu0 %v4630_v39  ;;  %3052 = vmatpush1.bf16.msra.mxu1 %v4632_v40 }
 0x69f   :  { %3012 = vmatprep.subr.bf16.mxu0 %v4638_v41  ;;  %3053 = vmatprep.subr.bf16.mxu1 %v4640_v42 }
 0x6a2   :  { %3013 = vmatpush1.bf16.msra.mxu0 %v4642_v43  ;;  %3054 = vmatpush1.bf16.msra.mxu1 %v4644_v44 }
 0x745   :  { %v2713_v34 = vpop.f32.mrf.mxu0  ;;  %v2754_v33 = vpop.f32.mrf.mxu1 }
 0x746   :  { %v2761_v35 = vadd.f32 %v2713_v34, %v4860_v21  ;;  %v2763_v28 = vadd.f32 %v2754_v33, %v4863_v26  ;;  %v3922_v21 = vld [vmem:[#allocation7] sm:$0xff] }
 0x747   :  { %v2715_v36 = vpop.f32.mrf.mxu0  ;;  %v2756_v23 = vpop.f32.mrf.mxu1  ;;  %vm3592_vm7 = vcmp.gt.s32.totalorder %v3922_v21, 7 }
 0x748   :  { %v3553_v4 = vmul.f32 -1.442695, %v2761_v35  ;;  %v2762_v27 = vadd.f32 %v2715_v36, %v4861_v17  ;;  %v2764_v8 = vadd.f32 %v2756_v23, %v4862_v30 }
 0x749   :  { %v2717_v18 = vpop.f32.mrf.mxu0  ;;  %v2758_v31 = vpop.f32.mrf.mxu1 }
 0x74a   :  { %3890 = vpow2.f32 %v3553_v4  ;;  %v3554_v19 = vmul.f32 -1.442695, %v2762_v27  ;;  %v3555_v32 = vmul.f32 -1.442695, %v2764_v8 }
 0x74b   :  { %v2718_v25 = vpop.f32.mrf.mxu0  ;;  %v2759_v16 = vpop.f32.mrf.mxu1 }
 0x74c   :  { %3892 = vpow2.f32 %v3554_v19 }
 0x74d   :  { %3894 = vtanh.f32 %v2763_v28 }
 0x74e   :  { %3896 = vpow2.f32 %v3555_v32 }
 0x757   :  { %v3891_v20 = vpop.eup %3890 }
 0x758   :  { %v2768_v11 = vadd.f32 1.0, %v3891_v20 }
 0x759   :  { %v3893_v12 = vpop.eup %3892 }
 0x75a   :  { %3898 = vrcp.f32 %v2768_v11  ;;  %v2774_v15 = vadd.f32 1.0, %v3893_v12  ;;  %v3895_v24 = vpop.eup %3894 }
 0x75b   :  { %v3897_v38 = vpop.eup %3896 }
 0x75c   :  { %3900 = vrcp.f32 %v2774_v15  ;;  %v2781_v42 = vadd.f32 1.0, %v3897_v38 }
 0x75e   :  { %3902 = vrcp.f32 %v2781_v42 }
 0x767   :  { %v3899_v39 = vpop.eup %3898 }
 0x768   :  { %v2785_v40 = vmul.f32 %v3899_v39, %v3895_v24 }
 0x769   :  { %v3901_v41 = vpop.eup %3900 }
 0x76a   :  { %v2784_v43 = vmul.f32 %v3901_v41, %v4755_v6 }
 0x76b   :  { %v3903_v2 = vpop.eup %3902 }
 0x76c   :  { %v2786_v44 = vadd.f32 %v2785_v40, %v2784_v43 }
 0x76e   :  { %3904 = vtanh.f32 %v2786_v44  ;;  %v2794_v61 = vsel %vm3556_vm6, %v2786_v44, %v4755_v6 }
 0x77b   :  { %v3905_v48 = vpop.eup %3904 }
 0x77c   :  { %v2788_v49 = vmul.f32 %v3905_v48, %v3903_v2 }
 0x77e   :  { %v2792_v50 = vsel %vm3556_vm6, %v2788_v49, %v4758_v10 }
 0x77f   :  { %v2805_v47 = vpack.c.bf16 %v2792_v50, %v2792_v50 }
 0x781   :  { %3031 = vmatmul.mubr.bf16.vlgmr.msra.gmra.mxu0 %v2805_v47  ;;  %3072 = vmatmul.mubr.bf16.vlgmr.msra.gmra.mxu1 %v2805_v47 }
 0x841   :  { %v3032_v52 = vpop.f32.mrf.mxu0  ;;  %v3073_v53 = vpop.f32.mrf.mxu1 }
 0x842   :  { %v3080_v54 = vadd.f32 %v3032_v52, %v4864_v13  ;;  %v3082_v3 = vadd.f32 %v3073_v53, %v4865_v1 }
 0x843   :  { %v3034_v46 = vpop.f32.mrf.mxu0  ;;  %v3075_v57 = vpop.f32.mrf.mxu1 }
 0x844   :  { %v3589_v29 = vmul.f32 -1.442695, %v3080_v54  ;;  %v3081_v7 = vadd.f32 %v3034_v46, %v4438_v55  ;;  %v3083_v63 = vadd.f32 %v3075_v57, %v4441_v0 }
 0x845   :  { %v3036_v58 = vpop.f32.mrf.mxu0  ;;  %v3077_v59 = vpop.f32.mrf.mxu1 }
 0x846   :  { %3906 = vpow2.f32 %v3589_v29  ;;  %v3590_v60 = vmul.f32 -1.442695, %v3081_v7  ;;  %v3591_v51 = vmul.f32 -1.442695, %v3083_v63 }
 0x847   :  { %v3037_v22 = vpop.f32.mrf.mxu0  ;;  %v3078_v62 = vpop.f32.mrf.mxu1 }
 0x848   :  { %3908 = vpow2.f32 %v3590_v60 }
 0x849   :  { %3910 = vtanh.f32 %v3082_v3 }
 0x84a   :  { %3912 = vpow2.f32 %v3591_v51 }
 0x853   :  { %v3907_v5 = vpop.eup %3906 }
 0x854   :  { %v3087_v56 = vadd.f32 1.0, %v3907_v5 }
 0x855   :  { %v3909_v6 = vpop.eup %3908 }
 0x856   :  { %3914 = vrcp.f32 %v3087_v56  ;;  %v3093_v37 = vadd.f32 1.0, %v3909_v6  ;;  %v3911_v55 = vpop.eup %3910 }
 0x857   :  { %v3913_v9 = vpop.eup %3912 }
 0x858   :  { %3916 = vrcp.f32 %v3093_v37  ;;  %v3100_v34 = vadd.f32 1.0, %v3913_v9 }
 0x85a   :  { %3918 = vrcp.f32 %v3100_v34 }
 0x863   :  { %v3915_v14 = vpop.eup %3914 }
 0x864   :  { %v3104_v10 = vmul.f32 %v3915_v14, %v3911_v55 }
 0x865   :  { %v3917_v45 = vpop.eup %3916 }
 0x866   :  { %v3103_v33 = vmul.f32 %v3917_v45, %v2794_v61 }
 0x867   :  { %v3919_v36 = vpop.eup %3918 }
 0x868   :  { %v3105_v0 = vadd.f32 %v3104_v10, %v3103_v33 }
 0x86a   :  { %3920 = vtanh.f32 %v3105_v0  ;;  %v3113_v35 = vsel %vm3592_vm7, %v3105_v0, %v2794_v61 }
 0x86b   :  { %3114 = vst [vmem:[#allocation3] sm:$0xff] %v3113_v35 }
 0x877   :  { %v3921_v23 = vpop.eup %3920 }
 0x878   :  { %v3107_v4 = vmul.f32 %v3921_v23, %v3919_v36 }
 0x87a   :  { %v3111_v17 = vsel %vm3592_vm7, %v3107_v4, %v2792_v50 }
 0x87b   :  { %3112 = vst [vmem:[#allocation2] sm:$0xff] %v3111_v17 }
 0x87c PF:  { %v3923_v27 = vld [vmem:[#allocation18 + $0x38] sm:$0xff]   ;;  %v4117_v18 = vmov 0.0   ;;  %v3924_v31 = vld [vmem:[#allocation18 + $0x30] sm:$0xff]   ;;  %vm4118_vm8 = vmmov 0   ;;  %v3925_v19 = vld [vmem:[#allocation18 + $0x28] sm:$0xff]   ;;  %s4119_s8 = smov [#allocation19]  }
 0x87d   :  { %3611 = vmatprep.subr.bf16.mxu0 %v4117_v18  ;;  %3627 = vmatprep.mubr.msk.bf16.mxu0 %vm4118_vm8, %v4117_v18  ;;  %v3926_v25 = vld [vmem:[#allocation18 + $0x20] sm:$0xff]   ;;  %v3927_v16 = vld [vmem:[#allocation18 + $0x18] sm:$0xff]   ;;  %v3928_v30 = vld [vmem:[#allocation18 + $0x10] sm:$0xff]   ;;  %s3248_s16 = sshll.u32 %s4119_s8, 4  ;;  %s3249_s16 = int_to_ptr.vmem [resolvable:$true] %s3248_s16 }
 0x87e   :  { %3612 = vmatpush3.bf16.msra.mxu0 %v3923_v27  ;;  %v3929_v8 = vld [vmem:[#allocation18 + $0x8] sm:$0xff]   ;;  %v3930_v26 = vld [vmem:[#allocation18] sm:$0xff]   ;;  %v3593_v20 = vld [vmem:[%s4821_s9] ss:$0 sm:$0xff]  ;;  %s4075_s9 = scalar_lea.vmem %s3249_s16, 128  ;;  %p4080_p9 = scmp.lt.s32.totalorder %s3249_s16, %s3249_s16 }
 0x87f   :  { %3613 = vmatprep.subr.bf16.mxu0 %v4117_v18  ;;  %p4076_p8 = scmp.ne.s32.totalorder %s3249_s16, %s4075_s9  ;;  %p4081_p10 = scmp.lt.s32.totalorder %s4075_s9, %s4075_s9 }
 0x881   :  { %p4082_p11 = por %p4081_p10, %p4080_p9 }
 0x882   :  { %3614 = vmatpush3.bf16.msra.mxu0 %v3924_v31  ;;  %v3118_v28 = vld [vmem:[#allocation2] sm:$0xff] }
 0x883   :  { %3615 = vmatprep.subr.bf16.mxu0 %v4117_v18  ;;  %v3119_v32 = vpack.c.bf16 %v3118_v28, %v3118_v28  ;;  %p4083_p12 = pnand %p4082_p11, %p4076_p8 }
 0x886   :  { %3616 = vmatpush3.bf16.msra.mxu0 %v3925_v19 }
 0x887   :  { %3617 = vmatprep.subr.bf16.mxu0 %v4117_v18 }
 0x88a   :  { %3618 = vmatpush3.bf16.msra.mxu0 %v3926_v25 }
 0x88b   :  { %3619 = vmatprep.subr.bf16.mxu0 %v4117_v18 }
 0x88e   :  { %3620 = vmatpush3.bf16.msra.mxu0 %v3927_v16 }
 0x88f   :  { %3621 = vmatprep.subr.bf16.mxu0 %v4117_v18 }
 0x892   :  { %3622 = vmatpush3.bf16.msra.mxu0 %v3928_v30 }
 0x893   :  { %3623 = vmatprep.subr.bf16.mxu0 %v4117_v18 }
 0x896   :  { %3624 = vmatpush3.bf16.msra.mxu0 %v3929_v8 }
 0x897   :  { %3625 = vmatprep.subr.bf16.mxu0 %v4117_v18 }
 0x89a   :  { %3626 = vmatpush3.bf16.msra.mxu0 %v3930_v26 }
 0x89d   :  { %3628 = vmatmul.mubr.bf16.vlgmr.msra.gmra.mxu0 %v3119_v32 }
 0x95d   :  { %v3225_v11 = vpop.f32.mrf.mxu0 }
 0x95e   :  { %v3226_v12 = vadd.f32 %v3593_v20, %v3225_v11 }
 0x95f   :  { %v3629_v15 = vpop.f32.mrf.mxu0 }
 0x960   :  { %3231 = vmax.xlane.f32.xlu0 %v3226_v12 }
 0x961   :  { %v3228_v24 = vpop.f32.mrf.mxu0 }
 0x963   :  { %v3630_v38 = vpop.f32.mrf.mxu0 }
 0x9e9   :  { %v3232_v39 = vpop.xlane.xlu0 %3231 }
 0x9ea   :  { %v3233_v40 = vsub.f32 %v3226_v12, %v3232_v39 }
 0x9ec   :  { %v3234_v41 = vmul.f32 1.442695, %v3233_v40 }
 0x9ee   :  { %3931 = vpow2.f32 %v3234_v41 }
 0x9fb   :  { %v3932_v42 = vpop.eup %3931 }
 0x9fc   :  { %3236 = vadd.xlane.f32.xlu0 %v3932_v42 }
 0xa85   :  { %v3237_v43 = vpop.xlane.xlu0 %3236 }
 0xa86   :  { %3933 = vlog2.f32 %v3237_v43 }
 0xa93   :  { %v3934_v44 = vpop.eup %3933 }
 0xa94   :  { %v3239_v61 = vmul.f32 0.6931472, %v3934_v44 }
 0xa96   :  { %v3240_v2 = vsub.f32 %v3233_v40, %v3239_v61 }
 0xa98   :  { %3241 = vst [vmem:[#allocation19] sm:$0xff] %v3240_v2 }
 0xa99   :  { %4086 = shalt.err (!%p4083_p12)
}
 0xa9a   :  { %3251 = dma.vmem_to_hbm [thread:$0]  %s3249_s16, 128, %s4822_s10, [#allocation9]  }
 0xa9b   :  { %4103 = dma.done.wait [#allocation9], 128  }
 0xa9c   :  { %4104 = vsyncadd [#allocation9], 4294967168 }
 0xa9d   :  { %3255 = vsyncpa [#allocation8], 1 }
 0xa9e   :  { %3256 = vsyncpa [#allocation11], 1 }
 0xa9f   :  { %3257 = vsyncpa [#allocation14], 1 }
 0xaa0   :  { %3258 = vsyncpa [#allocation17], 1 }
 0xaa1   :  { %3259 = vsyncpa [#allocation9], 1 }

</bundles_post_ra>
